<compile_context>
chip_gen: v6e
topology: v6e:2x2x1
jax: 0.10.0
libtpu: 0.0.40
codegen_flags: <defaults>
</compile_context>

<pallas_src>
from functools import partial

import numpy as np
import jax
import jax.numpy as jnp
from jax.experimental import pallas as pl
from jax.experimental.pallas import tpu as pltpu

NORMALIZED = False            # audio_config.signal_norm stand-in
EPS = 1e-7

# Only request single-buffering of the basis when double-buffering it would
# actually waste meaningful VMEM (large n_fft); tiny bases don't matter.
SINGLE_BUFFER_BASIS_BYTES = 2 * 1024 * 1024


def _round_up(x, m):
    return ((x + m - 1) // m) * m


def _cdiv(a, b):
    return -(-a // b)


def _hw_params():
    """Generation-aware knobs: (g_parallel, vmem_limit_bytes, base_tile_m)."""
    kind = ""
    try:
        kind = jax.devices()[0].device_kind.lower()
    except Exception:
        pass
    vmem_cap = None
    try:
        vmem_cap = int(pltpu.get_tpu_info().vmem_capacity_bytes)
    except Exception:
        pass
    is_v7 = "v7" in kind
    known = any(g in kind for g in ("v4", "v5", "v6", "v7"))
    if vmem_cap is None:
        vmem_cap = (64 if is_v7 else (128 if known else 32)) * 1024 * 1024
    # leave ~15% headroom below physical VMEM for compiler-internal scratch
    vmem_limit = min(int(vmem_cap * 0.85), 110 * 1024 * 1024)
    g_parallel = 2 if is_v7 else 1        # megacore only on v7x
    base_tile_m = 384 if is_v7 else 512   # 128 MiB VMEM on v5e/v6e -> bigger tiles
    return g_parallel, vmem_limit, base_tile_m


def _pick_tile_m(M, n_pad, k_pad, base_tile_m, vmem_limit_bytes):
    """Prefer fewer, larger grid steps; stay inside the VMEM budget."""
    # small-FFT resolutions: per-step compute is tiny vs. the ~0.35us fixed
    # per-step overhead, so allow twice the row cap.
    cap = base_tile_m if n_pad > 512 else 2 * base_tile_m
    # crude per-row VMEM model (bytes): double-buffered bf16 LHS rows (x & y
    # fused -> 2 rows/step), f32 DFT result, ~6 live f32 epilogue temps.
    per_row = 2 * (2 * n_pad * 2) + 2 * (2 * k_pad) * 4 + 6 * k_pad * 4
    fixed = 2 * (n_pad * 2 * k_pad * 2)   # basis (assume double-buffered worst case)
    budget = int(0.75 * vmem_limit_bytes) - fixed
    if budget > 0:
        cap = min(cap, budget // per_row)
    cap = max(8, (cap // 8) * 8)
    return min(cap, _round_up(max(M, 1), 8))


def _hann_window(win_length):
    # torch.hann_window default (periodic=True)
    n = np.arange(win_length, dtype=np.float64)
    return 0.5 - 0.5 * np.cos(2.0 * np.pi * n / win_length)


def _padded_window(fft_size, win_length):
    # torch.stft center-pads the window to n_fft
    w = np.zeros(fft_size, dtype=np.float64)
    lpad = (fft_size - win_length) // 2
    w[lpad:lpad + win_length] = _hann_window(win_length)
    return w


def _dft_basis(fft_size, win_length, n_pad, k_pad):
    """Windowed one-sided real-DFT basis, [cos | -sin] fused along lanes.

    Returned shape: (n_pad, 2*k_pad), bf16, zero padded (loss-neutral)."""
    w = _padded_window(fft_size, win_length)
    k = fft_size // 2 + 1
    n = np.arange(fft_size, dtype=np.float64)[:, None]
    kk = np.arange(k, dtype=np.float64)[None, :]
    ang = 2.0 * np.pi * n * kk / fft_size
    b = np.zeros((n_pad, 2 * k_pad), dtype=np.float32)
    b[:fft_size, :k] = (w[:, None] * np.cos(ang)).astype(np.float32)
    b[:fft_size, k_pad:k_pad + k] = (-w[:, None] * np.sin(ang)).astype(np.float32)
    if NORMALIZED:
        b /= np.sqrt(fft_size)
    return jnp.asarray(b, dtype=jnp.bfloat16)


def _frames(sig, fft_size, hop):
    """sig: (B, T) f32 -> (B * n_frames, fft_size), n_frames.
    Matches torch.stft(center=True, pad_mode='reflect')."""
    B, T = sig.shape
    pad = fft_size // 2
    sp = jnp.pad(sig, ((0, 0), (pad, pad)), mode="reflect")
    n_frames = 1 + (T + 2 * pad - fft_size) // hop
    idx = jnp.arange(n_frames)[:, None] * hop + jnp.arange(fft_size)[None, :]
    fr = sp[:, idx]                       # (B, n_frames, fft_size)
    return fr.reshape(B * n_frames, fft_size), n_frames


# ----------------------------- Pallas kernel -------------------------------

def _stft_loss_kernel(xy_ref, b_ref, out_ref):
    i = pl.program_id(1)                  # reduction ('arbitrary') axis

    @pl.when(i == 0)
    def _init():
        out_ref[...] = jnp.zeros_like(out_ref)

    # ONE fused bf16 MXU matmul per step: x rows stacked on top of y rows,
    # [cos | -sin] fused along the lanes of the resident basis; f32 accumulate.
    z = jnp.dot(xy_ref[...], b_ref[...], preferred_element_type=jnp.float32)
    tm = z.shape[0] // 2
    kp = z.shape[1] // 2
    zx = z[:tm, :]                        # sublane-aligned row split, no copy
    zy = z[tm:, :]
    xr, xi = zx[:, :kp], zx[:, kp:]       # lane-aligned column split
    yr, yi = zy[:, :kp], zy[:, kp:]
    sqx = xr * xr + xi * xi               # |X|^2
    sqy = yr * yr + yi * yi               # |Y|^2
    mx = jnp.sqrt(sqx)                    # |X|
    my = jnp.sqrt(sqy)                    # |Y|
    diff = my - mx
    d2 = diff * diff                      # (|Y|-|X|)^2 directly: no cancellation
    # exact torch form; zero-padded rows / frequency lanes contribute exactly 0
    l1 = jnp.abs(jnp.log(mx + EPS) - jnp.log(my + EPS))

    def rowsum8(t):                       # (tm, kp) -> (8, kp): VPU-only adds,
        return jnp.sum(t.reshape(tm // 8, 8, kp), axis=0)   # no per-step XLU

    # Per-lane partial sums accumulated directly into the VMEM-resident output
    # block (same block index across the arbitrary axis); the single cross-lane
    # reduction happens once in the wrapper, not every grid step.
    out_ref[0:8, :] = out_ref[0:8, :] + rowsum8(d2)
    out_ref[8:16, :] = out_ref[8:16, :] + rowsum8(sqy)
    out_ref[16:24, :] = out_ref[16:24, :] + rowsum8(l1)


def _stft_loss_terms(xy, basis, tile_m, tpg, g_parallel, vmem_limit):
    """xy: (g*tpg*2*tile_m, n_pad) bf16 (x/y rows interleaved per tile);
    basis: (n_pad, 2*k_pad) bf16.
    Returns (g_parallel*24, k_pad) f32 per-lane partials:
      rows [0:8)=(|Y|-|X|)^2, [8:16)=|Y|^2, [16:24)=|log ratio| per group."""
    rows_tot, n_pad = xy.shape
    k2 = basis.shape[1]
    k_pad = k2 // 2
    m_tot = rows_tot // 2                 # frames per signal incl. zero padding

    basis_bytes = n_pad * k2 * 2
    basis_kwargs = {}
    if basis_bytes >= SINGLE_BUFFER_BASIS_BYTES:
        # resident operand (constant index map): single-buffer to free VMEM
        basis_kwargs["pipeline_mode"] = pl.Buffered(1)

    flops = 2 * rows_tot * n_pad * k2                      # one fused dot / step
    transcendentals = 4 * m_tot * k_pad                    # 2 sqrt + 2 log / bin
    bytes_accessed = rows_tot * n_pad * 2 + basis_bytes + g_parallel * 24 * k_pad * 4

    return pl.pallas_call(
        _stft_loss_kernel,
        out_shape=jax.ShapeDtypeStruct((g_parallel * 24, k_pad), jnp.float32),
        grid_spec=pltpu.PrefetchScalarGridSpec(
            num_scalar_prefetch=0,
            grid=(g_parallel, tpg),
            in_specs=[
                pl.BlockSpec((2 * tile_m, n_pad), lambda p, i: (p * tpg + i, 0)),
                pl.BlockSpec((n_pad, k2), lambda p, i: (0, 0), **basis_kwargs),
            ],
            out_specs=pl.BlockSpec((24, k_pad), lambda p, i: (p, 0)),
        ),
        compiler_params=pltpu.CompilerParams(
            dimension_semantics=("parallel", "arbitrary"),
            vmem_limit_bytes=int(vmem_limit),
        ),
        cost_estimate=pl.CostEstimate(
            flops=int(flops),
            transcendentals=int(transcendentals),
            bytes_accessed=int(bytes_accessed),
        ),
    )(xy, basis)


# ------------------------------- wrapper ------------------------------------

@partial(jax.jit, static_argnums=(2, 3, 4))
def multi_resolution_stft_loss(x, y, fft_sizes, hop_sizes, win_lengths):
    """x, y: (B, 1, T) float32. Returns scalar loss (f32)."""
    xs = x[:, 0, :].astype(jnp.float32)
    ys = y[:, 0, :].astype(jnp.float32)
    B = xs.shape[0]

    g_parallel, vmem_limit, base_tile_m = _hw_params()

    sc_loss = jnp.float32(0.0)
    mag_loss = jnp.float32(0.0)
    for fft_size, hop, win in zip(fft_sizes, hop_sizes, win_lengths):
        xf, n_frames = _frames(xs, fft_size, hop)
        yf, _ = _frames(ys, fft_size, hop)
        K = fft_size // 2 + 1

        n_pad = _round_up(fft_size, 128)
        k_pad = _round_up(K, 128)
        M = xf.shape[0]
        tile_m = _pick_tile_m(M, n_pad, k_pad, base_tile_m, vmem_limit)
        tpg = _cdiv(_cdiv(M, tile_m), g_parallel)     # M-tiles per parallel group
        n_tiles = g_parallel * tpg
        m_tot = n_tiles * tile_m

        # zero padding is loss-neutral (see kernel); bf16 feeds the MXU natively
        xf = jnp.pad(xf, ((0, m_tot - M), (0, n_pad - fft_size))).astype(jnp.bfloat16)
        yf = jnp.pad(yf, ((0, m_tot - M), (0, n_pad - fft_size))).astype(jnp.bfloat16)
        # interleave x/y rows per tile so each grid step issues a single fused
        # MXU matmul against the shared basis RHS (halves weight pushes/pops)
        xy = jnp.concatenate(
            [xf.reshape(n_tiles, tile_m, n_pad),
             yf.reshape(n_tiles, tile_m, n_pad)], axis=1,
        ).reshape(n_tiles * 2 * tile_m, n_pad)

        basis = _dft_basis(fft_size, win, n_pad, k_pad)   # jit-time bf16 constant

        out = _stft_loss_terms(xy, basis, tile_m, tpg, g_parallel, vmem_limit)
        sums = out.reshape(g_parallel, 3, 8, k_pad).sum(axis=(0, 2, 3))
        d2, y2, l1 = sums[0], sums[1], sums[2]            # d2 >= 0 by construction

        sc_loss = sc_loss + jnp.sqrt(d2) / jnp.sqrt(y2)
        mag_loss = mag_loss + l1 / (B * n_frames * K)

    n_res = len(fft_sizes)
    return sc_loss / n_res + mag_loss / n_res


# -------------------------- pure-JAX reference ------------------------------

def _reference_loss(x, y, fft_sizes, hop_sizes, win_lengths):
    xs = x[:, 0, :].astype(jnp.float32)
    ys = y[:, 0, :].astype(jnp.float32)
    sc = 0.0
    mg = 0.0
    for fft_size, hop, win in zip(fft_sizes, hop_sizes, win_lengths):
        w = jnp.asarray(_padded_window(fft_size, win).astype(np.float32))
        xf, _ = _frames(xs, fft_size, hop)
        yf, _ = _frames(ys, fft_size, hop)
        scale = 1.0 / np.sqrt(fft_size) if NORMALIZED else 1.0
        xm = jnp.abs(jnp.fft.rfft(xf * w, axis=-1)) * scale
        ym = jnp.abs(jnp.fft.rfft(yf * w, axis=-1)) * scale
        sc = sc + jnp.linalg.norm(ym - xm) / jnp.linalg.norm(ym)
        mg = mg + jnp.mean(jnp.abs(jnp.log(xm + EPS) - jnp.log(ym + EPS)))
    n = len(fft_sizes)
    return sc / n + mg / n


if __name__ == "__main__":
    fft_sizes = (64, 128, 32)
    hop_sizes = (16, 32, 8)
    win_lengths = (32, 64, 16)

    B, T = 2, 256
    key = jax.random.PRNGKey(0)
    kx, ky = jax.random.split(key)
    x = jax.random.normal(kx, (B, 1, T), dtype=jnp.float32)
    y = x + 0.1 * jax.random.normal(ky, (B, 1, T), dtype=jnp.float32)

    loss = multi_resolution_stft_loss(x, y, fft_sizes, hop_sizes, win_lengths)
    loss = jax.block_until_ready(loss)

    ref = jax.block_until_ready(
        _reference_loss(x, y, fft_sizes, hop_sizes, win_lengths))

    assert np.isfinite(float(loss)), float(loss)
    # bf16 MXU inputs/basis introduce ~1e-3-level relative deviation vs. the
    # f32 rfft reference (the spectral terms themselves are now exact forms);
    # 1e-2 still catches real bugs (wrong window / normalization / missing
    # resolution are all >10%).
    assert abs(float(loss) - float(ref)) <= 1e-2 * max(1.0, abs(float(ref))), (
        float(loss), float(ref))
    print("KERNEL_OK")
</pallas_src>

<mosaic_0001>
module attributes {stable_mosaic.version = 11 : i64} {
  func.func @_stft_loss_kernel(%arg0: i32, %arg1: i32, %arg2: memref<48x128xbf16, #tpu.memory_space<vmem>>, %arg3: memref<128x256xbf16, #tpu.memory_space<vmem>>, %arg4: memref<24x128xf32, #tpu.memory_space<vmem>>) attributes {dimension_semantics = [#tpu.dimension_semantics<parallel>, #tpu.dimension_semantics<arbitrary>], iteration_bounds = array<i64: 1, 1>, scalar_prefetch = 0 : i64, scratch_operands = 0 : i64, tpu.core_type = #tpu.core_type<tc>, window_params = [{transform_indices = @transform_0, window_bounds = array<i64: 48, 128>}, {pipeline_mode = #tpu.pipeline_mode<synchronous>, transform_indices = @transform_1, window_bounds = array<i64: 128, 256>}, {transform_indices = @transform_2, window_bounds = array<i64: 24, 128>}]} {
    %c0_i32 = arith.constant 0 : i32
    %0 = arith.cmpi eq, %arg1, %c0_i32 : i32
    %1 = arith.extui %0 : i1 to i32
    %c0_i32_0 = arith.constant 0 : i32
    %2 = arith.cmpi ne, %1, %c0_i32_0 : i32
    scf.if %2 {
      %cst_19 = arith.constant 0.000000e+00 : f32
      %45 = vector.broadcast %cst_19 : f32 to vector<24x128xf32>
      %c0_20 = arith.constant 0 : index
      %c0_21 = arith.constant 0 : index
      %46 = vector.load %arg4[%c0_20, %c0_21] : memref<24x128xf32, #tpu.memory_space<vmem>>, vector<24x128xf32>
      tpu.vector_store %arg4[%c0_20, %c0_21], %45 {strides = array<i32>} : memref<24x128xf32, #tpu.memory_space<vmem>>, vector<24x128xf32>,
    } else {
    }
    %c0 = arith.constant 0 : index
    %c0_1 = arith.constant 0 : index
    %3 = vector.load %arg2[%c0, %c0_1] : memref<48x128xbf16, #tpu.memory_space<vmem>>, vector<48x128xbf16>
    %c0_2 = arith.constant 0 : index
    %c0_3 = arith.constant 0 : index
    %4 = vector.load %arg3[%c0_2, %c0_3] : memref<128x256xbf16, #tpu.memory_space<vmem>>, vector<128x256xbf16>
    %cst = arith.constant dense<0.000000e+00> : vector<48x256xf32>
    %5 = tpu.matmul %3, %4, %cst {dimension_numbers = #tpu.dot_dimension_numbers<[1], [0], [0], [1], [0, 0, 1, 1], [], []>} : vector<48x128xbf16>, vector<128x256xbf16>, vector<48x256xf32> -> vector<48x256xf32>
    %6 = vector.extract_strided_slice %5 {offsets = [0, 0], sizes = [24, 256], strides = [1, 1]} : vector<48x256xf32> to vector<24x256xf32>
    %7 = vector.extract_strided_slice %5 {offsets = [24, 0], sizes = [24, 256], strides = [1, 1]} : vector<48x256xf32> to vector<24x256xf32>
    %8 = vector.extract_strided_slice %6 {offsets = [0, 0], sizes = [24, 128], strides = [1, 1]} : vector<24x256xf32> to vector<24x128xf32>
    %9 = vector.extract_strided_slice %6 {offsets = [0, 128], sizes = [24, 128], strides = [1, 1]} : vector<24x256xf32> to vector<24x128xf32>
    %10 = vector.extract_strided_slice %7 {offsets = [0, 0], sizes = [24, 128], strides = [1, 1]} : vector<24x256xf32> to vector<24x128xf32>
    %11 = vector.extract_strided_slice %7 {offsets = [0, 128], sizes = [24, 128], strides = [1, 1]} : vector<24x256xf32> to vector<24x128xf32>
    %12 = arith.mulf %8, %8 : vector<24x128xf32>
    %13 = arith.mulf %9, %9 : vector<24x128xf32>
    %14 = arith.addf %12, %13 : vector<24x128xf32>
    %15 = arith.mulf %10, %10 : vector<24x128xf32>
    %16 = arith.mulf %11, %11 : vector<24x128xf32>
    %17 = arith.addf %15, %16 : vector<24x128xf32>
    %18 = math.sqrt %14 : vector<24x128xf32>
    %19 = math.sqrt %17 : vector<24x128xf32>
    %20 = arith.subf %19, %18 : vector<24x128xf32>
    %21 = arith.mulf %20, %20 : vector<24x128xf32>
    %cst_4 = arith.constant 1.000000e-07 : f32
    %22 = vector.broadcast %cst_4 : f32 to vector<24x128xf32>
    %23 = arith.addf %18, %22 : vector<24x128xf32>
    %24 = math.log %23 : vector<24x128xf32>
    %cst_5 = arith.constant 1.000000e-07 : f32
    %25 = vector.broadcast %cst_5 : f32 to vector<24x128xf32>
    %26 = arith.addf %19, %25 : vector<24x128xf32>
    %27 = math.log %26 : vector<24x128xf32>
    %28 = arith.subf %24, %27 : vector<24x128xf32>
    %29 = math.absf %28 : vector<24x128xf32>
    %c0_6 = arith.constant 0 : index
    %c0_7 = arith.constant 0 : index
    %30 = vector.load %arg4[%c0_6, %c0_7] : memref<24x128xf32, #tpu.memory_space<vmem>>, vector<8x128xf32>
    %31 = vector.shape_cast %21 : vector<24x128xf32> to vector<3x8x128xf32>
    %cst_8 = arith.constant dense<0.000000e+00> : vector<8x128xf32>
    %32 = vector.multi_reduction <add>, %31, %cst_8 [0] : vector<3x8x128xf32> to vector<8x128xf32>
    %33 = arith.addf %30, %32 : vector<8x128xf32>
    %c0_9 = arith.constant 0 : index
    %c0_10 = arith.constant 0 : index
    %34 = vector.load %arg4[%c0_9, %c0_10] : memref<24x128xf32, #tpu.memory_space<vmem>>, vector<8x128xf32>
    tpu.vector_store %arg4[%c0_9, %c0_10], %33 {strides = array<i32>} : memref<24x128xf32, #tpu.memory_space<vmem>>, vector<8x128xf32>,
    %c8 = arith.constant 8 : index
    %c0_11 = arith.constant 0 : index
    %35 = vector.load %arg4[%c8, %c0_11] : memref<24x128xf32, #tpu.memory_space<vmem>>, vector<8x128xf32>
    %36 = vector.shape_cast %17 : vector<24x128xf32> to vector<3x8x128xf32>
    %cst_12 = arith.constant dense<0.000000e+00> : vector<8x128xf32>
    %37 = vector.multi_reduction <add>, %36, %cst_12 [0] : vector<3x8x128xf32> to vector<8x128xf32>
    %38 = arith.addf %35, %37 : vector<8x128xf32>
    %c8_13 = arith.constant 8 : index
    %c0_14 = arith.constant 0 : index
    %39 = vector.load %arg4[%c8_13, %c0_14] : memref<24x128xf32, #tpu.memory_space<vmem>>, vector<8x128xf32>
    tpu.vector_store %arg4[%c8_13, %c0_14], %38 {strides = array<i32>} : memref<24x128xf32, #tpu.memory_space<vmem>>, vector<8x128xf32>,
    %c16 = arith.constant 16 : index
    %c0_15 = arith.constant 0 : index
    %40 = vector.load %arg4[%c16, %c0_15] : memref<24x128xf32, #tpu.memory_space<vmem>>, vector<8x128xf32>
    %41 = vector.shape_cast %29 : vector<24x128xf32> to vector<3x8x128xf32>
    %cst_16 = arith.constant dense<0.000000e+00> : vector<8x128xf32>
    %42 = vector.multi_reduction <add>, %41, %cst_16 [0] : vector<3x8x128xf32> to vector<8x128xf32>
    %43 = arith.addf %40, %42 : vector<8x128xf32>
    %c16_17 = arith.constant 16 : index
    %c0_18 = arith.constant 0 : index
    %44 = vector.load %arg4[%c16_17, %c0_18] : memref<24x128xf32, #tpu.memory_space<vmem>>, vector<8x128xf32>
    tpu.vector_store %arg4[%c16_17, %c0_18], %43 {strides = array<i32>} : memref<24x128xf32, #tpu.memory_space<vmem>>, vector<8x128xf32>,
    return
  }
  func.func @transform_0(%arg0: i32, %arg1: i32) -> (i32, i32) {
    %c1_i32 = arith.constant 1 : i32
    %0 = arith.muli %arg0, %c1_i32 : i32
    %1 = arith.addi %0, %arg1 : i32
    %c0_i32 = arith.constant 0 : i32
    %c0_i32_0 = arith.constant 0 : i32
    return %1, %c0_i32 : i32, i32
  }
  func.func @transform_1(%arg0: i32, %arg1: i32) -> (i32, i32) {
    %c0_i32 = arith.constant 0 : i32
    %c0_i32_0 = arith.constant 0 : i32
    %c0_i32_1 = arith.constant 0 : i32
    return %c0_i32, %c0_i32_0 : i32, i32
  }
  func.func @transform_2(%arg0: i32, %arg1: i32) -> (i32, i32) {
    %c0_i32 = arith.constant 0 : i32
    %c0_i32_0 = arith.constant 0 : i32
    return %arg0, %c0_i32 : i32, i32
  }
}

module attributes {stable_mosaic.version = 11 : i64} {
  func.func @_stft_loss_kernel(%arg0: i32, %arg1: i32, %arg2: memref<80x128xbf16, #tpu.memory_space<vmem>>, %arg3: memref<128x256xbf16, #tpu.memory_space<vmem>>, %arg4: memref<24x128xf32, #tpu.memory_space<vmem>>) attributes {dimension_semantics = [#tpu.dimension_semantics<parallel>, #tpu.dimension_semantics<arbitrary>], iteration_bounds = array<i64: 1, 1>, scalar_prefetch = 0 : i64, scratch_operands = 0 : i64, tpu.core_type = #tpu.core_type<tc>, window_params = [{transform_indices = @transform_0, window_bounds = array<i64: 80, 128>}, {pipeline_mode = #tpu.pipeline_mode<synchronous>, transform_indices = @transform_1, window_bounds = array<i64: 128, 256>}, {transform_indices = @transform_2, window_bounds = array<i64: 24, 128>}]} {
    %c0_i32 = arith.constant 0 : i32
    %0 = arith.cmpi eq, %arg1, %c0_i32 : i32
    %1 = arith.extui %0 : i1 to i32
    %c0_i32_0 = arith.constant 0 : i32
    %2 = arith.cmpi ne, %1, %c0_i32_0 : i32
    scf.if %2 {
      %cst_19 = arith.constant 0.000000e+00 : f32
      %45 = vector.broadcast %cst_19 : f32 to vector<24x128xf32>
      %c0_20 = arith.constant 0 : index
      %c0_21 = arith.constant 0 : index
      %46 = vector.load %arg4[%c0_20, %c0_21] : memref<24x128xf32, #tpu.memory_space<vmem>>, vector<24x128xf32>
      tpu.vector_store %arg4[%c0_20, %c0_21], %45 {strides = array<i32>} : memref<24x128xf32, #tpu.memory_space<vmem>>, vector<24x128xf32>,
    } else {
    }
    %c0 = arith.constant 0 : index
    %c0_1 = arith.constant 0 : index
    %3 = vector.load %arg2[%c0, %c0_1] : memref<80x128xbf16, #tpu.memory_space<vmem>>, vector<80x128xbf16>
    %c0_2 = arith.constant 0 : index
    %c0_3 = arith.constant 0 : index
    %4 = vector.load %arg3[%c0_2, %c0_3] : memref<128x256xbf16, #tpu.memory_space<vmem>>, vector<128x256xbf16>
    %cst = arith.constant dense<0.000000e+00> : vector<80x256xf32>
    %5 = tpu.matmul %3, %4, %cst {dimension_numbers = #tpu.dot_dimension_numbers<[1], [0], [0], [1], [0, 0, 1, 1], [], []>} : vector<80x128xbf16>, vector<128x256xbf16>, vector<80x256xf32> -> vector<80x256xf32>
    %6 = vector.extract_strided_slice %5 {offsets = [0, 0], sizes = [40, 256], strides = [1, 1]} : vector<80x256xf32> to vector<40x256xf32>
    %7 = vector.extract_strided_slice %5 {offsets = [40, 0], sizes = [40, 256], strides = [1, 1]} : vector<80x256xf32> to vector<40x256xf32>
    %8 = vector.extract_strided_slice %6 {offsets = [0, 0], sizes = [40, 128], strides = [1, 1]} : vector<40x256xf32> to vector<40x128xf32>
    %9 = vector.extract_strided_slice %6 {offsets = [0, 128], sizes = [40, 128], strides = [1, 1]} : vector<40x256xf32> to vector<40x128xf32>
    %10 = vector.extract_strided_slice %7 {offsets = [0, 0], sizes = [40, 128], strides = [1, 1]} : vector<40x256xf32> to vector<40x128xf32>
    %11 = vector.extract_strided_slice %7 {offsets = [0, 128], sizes = [40, 128], strides = [1, 1]} : vector<40x256xf32> to vector<40x128xf32>
    %12 = arith.mulf %8, %8 : vector<40x128xf32>
    %13 = arith.mulf %9, %9 : vector<40x128xf32>
    %14 = arith.addf %12, %13 : vector<40x128xf32>
    %15 = arith.mulf %10, %10 : vector<40x128xf32>
    %16 = arith.mulf %11, %11 : vector<40x128xf32>
    %17 = arith.addf %15, %16 : vector<40x128xf32>
    %18 = math.sqrt %14 : vector<40x128xf32>
    %19 = math.sqrt %17 : vector<40x128xf32>
    %20 = arith.subf %19, %18 : vector<40x128xf32>
    %21 = arith.mulf %20, %20 : vector<40x128xf32>
    %cst_4 = arith.constant 1.000000e-07 : f32
    %22 = vector.broadcast %cst_4 : f32 to vector<40x128xf32>
    %23 = arith.addf %18, %22 : vector<40x128xf32>
    %24 = math.log %23 : vector<40x128xf32>
    %cst_5 = arith.constant 1.000000e-07 : f32
    %25 = vector.broadcast %cst_5 : f32 to vector<40x128xf32>
    %26 = arith.addf %19, %25 : vector<40x128xf32>
    %27 = math.log %26 : vector<40x128xf32>
    %28 = arith.subf %24, %27 : vector<40x128xf32>
    %29 = math.absf %28 : vector<40x128xf32>
    %c0_6 = arith.constant 0 : index
    %c0_7 = arith.constant 0 : index
    %30 = vector.load %arg4[%c0_6, %c0_7] : memref<24x128xf32, #tpu.memory_space<vmem>>, vector<8x128xf32>
    %31 = vector.shape_cast %21 : vector<40x128xf32> to vector<5x8x128xf32>
    %cst_8 = arith.constant dense<0.000000e+00> : vector<8x128xf32>
    %32 = vector.multi_reduction <add>, %31, %cst_8 [0] : vector<5x8x128xf32> to vector<8x128xf32>
    %33 = arith.addf %30, %32 : vector<8x128xf32>
    %c0_9 = arith.constant 0 : index
    %c0_10 = arith.constant 0 : index
    %34 = vector.load %arg4[%c0_9, %c0_10] : memref<24x128xf32, #tpu.memory_space<vmem>>, vector<8x128xf32>
    tpu.vector_store %arg4[%c0_9, %c0_10], %33 {strides = array<i32>} : memref<24x128xf32, #tpu.memory_space<vmem>>, vector<8x128xf32>,
    %c8 = arith.constant 8 : index
    %c0_11 = arith.constant 0 : index
    %35 = vector.load %arg4[%c8, %c0_11] : memref<24x128xf32, #tpu.memory_space<vmem>>, vector<8x128xf32>
    %36 = vector.shape_cast %17 : vector<40x128xf32> to vector<5x8x128xf32>
    %cst_12 = arith.constant dense<0.000000e+00> : vector<8x128xf32>
    %37 = vector.multi_reduction <add>, %36, %cst_12 [0] : vector<5x8x128xf32> to vector<8x128xf32>
    %38 = arith.addf %35, %37 : vector<8x128xf32>
    %c8_13 = arith.constant 8 : index
    %c0_14 = arith.constant 0 : index
    %39 = vector.load %arg4[%c8_13, %c0_14] : memref<24x128xf32, #tpu.memory_space<vmem>>, vector<8x128xf32>
    tpu.vector_store %arg4[%c8_13, %c0_14], %38 {strides = array<i32>} : memref<24x128xf32, #tpu.memory_space<vmem>>, vector<8x128xf32>,
    %c16 = arith.constant 16 : index
    %c0_15 = arith.constant 0 : index
    %40 = vector.load %arg4[%c16, %c0_15] : memref<24x128xf32, #tpu.memory_space<vmem>>, vector<8x128xf32>
    %41 = vector.shape_cast %29 : vector<40x128xf32> to vector<5x8x128xf32>
    %cst_16 = arith.constant dense<0.000000e+00> : vector<8x128xf32>
    %42 = vector.multi_reduction <add>, %41, %cst_16 [0] : vector<5x8x128xf32> to vector<8x128xf32>
    %43 = arith.addf %40, %42 : vector<8x128xf32>
    %c16_17 = arith.constant 16 : index
    %c0_18 = arith.constant 0 : index
    %44 = vector.load %arg4[%c16_17, %c0_18] : memref<24x128xf32, #tpu.memory_space<vmem>>, vector<8x128xf32>
    tpu.vector_store %arg4[%c16_17, %c0_18], %43 {strides = array<i32>} : memref<24x128xf32, #tpu.memory_space<vmem>>, vector<8x128xf32>,
    return
  }
  func.func @transform_0(%arg0: i32, %arg1: i32) -> (i32, i32) {
    %c1_i32 = arith.constant 1 : i32
    %0 = arith.muli %arg0, %c1_i32 : i32
    %1 = arith.addi %0, %arg1 : i32
    %c0_i32 = arith.constant 0 : i32
    %c0_i32_0 = arith.constant 0 : i32
    return %1, %c0_i32 : i32, i32
  }
  func.func @transform_1(%arg0: i32, %arg1: i32) -> (i32, i32) {
    %c0_i32 = arith.constant 0 : i32
    %c0_i32_0 = arith.constant 0 : i32
    %c0_i32_1 = arith.constant 0 : i32
    return %c0_i32, %c0_i32_0 : i32, i32
  }
  func.func @transform_2(%arg0: i32, %arg1: i32) -> (i32, i32) {
    %c0_i32 = arith.constant 0 : i32
    %c0_i32_0 = arith.constant 0 : i32
    return %arg0, %c0_i32 : i32, i32
  }
}

module attributes {stable_mosaic.version = 11 : i64} {
  func.func @_stft_loss_kernel(%arg0: i32, %arg1: i32, %arg2: memref<144x128xbf16, #tpu.memory_space<vmem>>, %arg3: memref<128x256xbf16, #tpu.memory_space<vmem>>, %arg4: memref<24x128xf32, #tpu.memory_space<vmem>>) attributes {dimension_semantics = [#tpu.dimension_semantics<parallel>, #tpu.dimension_semantics<arbitrary>], iteration_bounds = array<i64: 1, 1>, scalar_prefetch = 0 : i64, scratch_operands = 0 : i64, tpu.core_type = #tpu.core_type<tc>, window_params = [{transform_indices = @transform_0, window_bounds = array<i64: 144, 128>}, {pipeline_mode = #tpu.pipeline_mode<synchronous>, transform_indices = @transform_1, window_bounds = array<i64: 128, 256>}, {transform_indices = @transform_2, window_bounds = array<i64: 24, 128>}]} {
    %c0_i32 = arith.constant 0 : i32
    %0 = arith.cmpi eq, %arg1, %c0_i32 : i32
    %1 = arith.extui %0 : i1 to i32
    %c0_i32_0 = arith.constant 0 : i32
    %2 = arith.cmpi ne, %1, %c0_i32_0 : i32
    scf.if %2 {
      %cst_19 = arith.constant 0.000000e+00 : f32
      %45 = vector.broadcast %cst_19 : f32 to vector<24x128xf32>
      %c0_20 = arith.constant 0 : index
      %c0_21 = arith.constant 0 : index
      %46 = vector.load %arg4[%c0_20, %c0_21] : memref<24x128xf32, #tpu.memory_space<vmem>>, vector<24x128xf32>
      tpu.vector_store %arg4[%c0_20, %c0_21], %45 {strides = array<i32>} : memref<24x128xf32, #tpu.memory_space<vmem>>, vector<24x128xf32>,
    } else {
    }
    %c0 = arith.constant 0 : index
    %c0_1 = arith.constant 0 : index
    %3 = vector.load %arg2[%c0, %c0_1] : memref<144x128xbf16, #tpu.memory_space<vmem>>, vector<144x128xbf16>
    %c0_2 = arith.constant 0 : index
    %c0_3 = arith.constant 0 : index
    %4 = vector.load %arg3[%c0_2, %c0_3] : memref<128x256xbf16, #tpu.memory_space<vmem>>, vector<128x256xbf16>
    %cst = arith.constant dense<0.000000e+00> : vector<144x256xf32>
    %5 = tpu.matmul %3, %4, %cst {dimension_numbers = #tpu.dot_dimension_numbers<[1], [0], [0], [1], [0, 0, 1, 1], [], []>} : vector<144x128xbf16>, vector<128x256xbf16>, vector<144x256xf32> -> vector<144x256xf32>
    %6 = vector.extract_strided_slice %5 {offsets = [0, 0], sizes = [72, 256], strides = [1, 1]} : vector<144x256xf32> to vector<72x256xf32>
    %7 = vector.extract_strided_slice %5 {offsets = [72, 0], sizes = [72, 256], strides = [1, 1]} : vector<144x256xf32> to vector<72x256xf32>
    %8 = vector.extract_strided_slice %6 {offsets = [0, 0], sizes = [72, 128], strides = [1, 1]} : vector<72x256xf32> to vector<72x128xf32>
    %9 = vector.extract_strided_slice %6 {offsets = [0, 128], sizes = [72, 128], strides = [1, 1]} : vector<72x256xf32> to vector<72x128xf32>
    %10 = vector.extract_strided_slice %7 {offsets = [0, 0], sizes = [72, 128], strides = [1, 1]} : vector<72x256xf32> to vector<72x128xf32>
    %11 = vector.extract_strided_slice %7 {offsets = [0, 128], sizes = [72, 128], strides = [1, 1]} : vector<72x256xf32> to vector<72x128xf32>
    %12 = arith.mulf %8, %8 : vector<72x128xf32>
    %13 = arith.mulf %9, %9 : vector<72x128xf32>
    %14 = arith.addf %12, %13 : vector<72x128xf32>
    %15 = arith.mulf %10, %10 : vector<72x128xf32>
    %16 = arith.mulf %11, %11 : vector<72x128xf32>
    %17 = arith.addf %15, %16 : vector<72x128xf32>
    %18 = math.sqrt %14 : vector<72x128xf32>
    %19 = math.sqrt %17 : vector<72x128xf32>
    %20 = arith.subf %19, %18 : vector<72x128xf32>
    %21 = arith.mulf %20, %20 : vector<72x128xf32>
    %cst_4 = arith.constant 1.000000e-07 : f32
    %22 = vector.broadcast %cst_4 : f32 to vector<72x128xf32>
    %23 = arith.addf %18, %22 : vector<72x128xf32>
    %24 = math.log %23 : vector<72x128xf32>
    %cst_5 = arith.constant 1.000000e-07 : f32
    %25 = vector.broadcast %cst_5 : f32 to vector<72x128xf32>
    %26 = arith.addf %19, %25 : vector<72x128xf32>
    %27 = math.log %26 : vector<72x128xf32>
    %28 = arith.subf %24, %27 : vector<72x128xf32>
    %29 = math.absf %28 : vector<72x128xf32>
    %c0_6 = arith.constant 0 : index
    %c0_7 = arith.constant 0 : index
    %30 = vector.load %arg4[%c0_6, %c0_7] : memref<24x128xf32, #tpu.memory_space<vmem>>, vector<8x128xf32>
    %31 = vector.shape_cast %21 : vector<72x128xf32> to vector<9x8x128xf32>
    %cst_8 = arith.constant dense<0.000000e+00> : vector<8x128xf32>
    %32 = vector.multi_reduction <add>, %31, %cst_8 [0] : vector<9x8x128xf32> to vector<8x128xf32>
    %33 = arith.addf %30, %32 : vector<8x128xf32>
    %c0_9 = arith.constant 0 : index
    %c0_10 = arith.constant 0 : index
    %34 = vector.load %arg4[%c0_9, %c0_10] : memref<24x128xf32, #tpu.memory_space<vmem>>, vector<8x128xf32>
    tpu.vector_store %arg4[%c0_9, %c0_10], %33 {strides = array<i32>} : memref<24x128xf32, #tpu.memory_space<vmem>>, vector<8x128xf32>,
    %c8 = arith.constant 8 : index
    %c0_11 = arith.constant 0 : index
    %35 = vector.load %arg4[%c8, %c0_11] : memref<24x128xf32, #tpu.memory_space<vmem>>, vector<8x128xf32>
    %36 = vector.shape_cast %17 : vector<72x128xf32> to vector<9x8x128xf32>
    %cst_12 = arith.constant dense<0.000000e+00> : vector<8x128xf32>
    %37 = vector.multi_reduction <add>, %36, %cst_12 [0] : vector<9x8x128xf32> to vector<8x128xf32>
    %38 = arith.addf %35, %37 : vector<8x128xf32>
    %c8_13 = arith.constant 8 : index
    %c0_14 = arith.constant 0 : index
    %39 = vector.load %arg4[%c8_13, %c0_14] : memref<24x128xf32, #tpu.memory_space<vmem>>, vector<8x128xf32>
    tpu.vector_store %arg4[%c8_13, %c0_14], %38 {strides = array<i32>} : memref<24x128xf32, #tpu.memory_space<vmem>>, vector<8x128xf32>,
    %c16 = arith.constant 16 : index
    %c0_15 = arith.constant 0 : index
    %40 = vector.load %arg4[%c16, %c0_15] : memref<24x128xf32, #tpu.memory_space<vmem>>, vector<8x128xf32>
    %41 = vector.shape_cast %29 : vector<72x128xf32> to vector<9x8x128xf32>
    %cst_16 = arith.constant dense<0.000000e+00> : vector<8x128xf32>
    %42 = vector.multi_reduction <add>, %41, %cst_16 [0] : vector<9x8x128xf32> to vector<8x128xf32>
    %43 = arith.addf %40, %42 : vector<8x128xf32>
    %c16_17 = arith.constant 16 : index
    %c0_18 = arith.constant 0 : index
    %44 = vector.load %arg4[%c16_17, %c0_18] : memref<24x128xf32, #tpu.memory_space<vmem>>, vector<8x128xf32>
    tpu.vector_store %arg4[%c16_17, %c0_18], %43 {strides = array<i32>} : memref<24x128xf32, #tpu.memory_space<vmem>>, vector<8x128xf32>,
    return
  }
  func.func @transform_0(%arg0: i32, %arg1: i32) -> (i32, i32) {
    %c1_i32 = arith.constant 1 : i32
    %0 = arith.muli %arg0, %c1_i32 : i32
    %1 = arith.addi %0, %arg1 : i32
    %c0_i32 = arith.constant 0 : i32
    %c0_i32_0 = arith.constant 0 : i32
    return %1, %c0_i32 : i32, i32
  }
  func.func @transform_1(%arg0: i32, %arg1: i32) -> (i32, i32) {
    %c0_i32 = arith.constant 0 : i32
    %c0_i32_0 = arith.constant 0 : i32
    %c0_i32_1 = arith.constant 0 : i32
    return %c0_i32, %c0_i32_0 : i32, i32
  }
  func.func @transform_2(%arg0: i32, %arg1: i32) -> (i32, i32) {
    %c0_i32 = arith.constant 0 : i32
    %c0_i32_0 = arith.constant 0 : i32
    return %arg0, %c0_i32 : i32, i32
  }
}

</mosaic_0001>

<bundles_post_ra>
// kernel: multi_resolution_stft_loss.4
= control target key start
LH: loop header
LB: loop body
LE: loop exit
PB: predicated region body
PF: predicated region fallthrough
CT: control target
= control target key end

     0   :  { %v427_v1 = vmov 0   ;;  %s509_s1 = inlined_call_operand.vmem [shape: bf16[128,256], index: 1, kind: input, shape index: {}]   ;;  %s510_s0 = inlined_call_operand.vmem [shape: bf16[48,128], index: 0, kind: input, shape index: {}]   ;;  %s511_s2 = inlined_call_operand.vmem [shape: f32[24,128], index: 2, kind: output, shape index: {}]  }
   0x1   :  { %v376_v0 = vld [vmem:[%s509_s1 + $0x74] ss:$8 sps:$4 sm:$0xff]   ;;  %193 = vmatprep.mubr.bf16.mxu0 %v427_v1  ;;  %203 = vmatprep.mubr.bf16.mxu1 %v427_v1  ;;  %v378_v2 = vld [vmem:[%s509_s1 + $0x70] ss:$8 sps:$4 sm:$0xff]   ;;  %v379_v3 = vld [vmem:[%s509_s1 + $0x64] ss:$8 sps:$4 sm:$0xff]  }
   0x2   :  { %161 = vmatprep.subr.bf16.mxu0 %v376_v0  ;;  %358 = vmatprep.subr.bf16.mxu1 %v376_v0  ;;  %v381_v4 = vld [vmem:[%s509_s1 + $0x60] ss:$8 sps:$4 sm:$0xff]   ;;  %v382_v5 = vld [vmem:[%s509_s1 + $0x54] ss:$8 sps:$4 sm:$0xff]   ;;  %v384_v6 = vld [vmem:[%s509_s1 + $0x50] ss:$8 sps:$4 sm:$0xff]  }
   0x3   :  { %162 = vmatpush1.bf16.msra.mxu0 %v378_v2  ;;  %366 = vmatpush1.bf16.msra.mxu1 %v378_v2  ;;  %v385_v7 = vld [vmem:[%s509_s1 + $0x44] ss:$8 sps:$4 sm:$0xff]   ;;  %v387_v8 = vld [vmem:[%s509_s1 + $0x40] ss:$8 sps:$4 sm:$0xff]   ;;  %v388_v9 = vld [vmem:[%s509_s1 + $0x34] ss:$8 sps:$4 sm:$0xff]  }
   0x4   :  { %163 = vmatprep.subr.bf16.mxu0 %v379_v3  ;;  %359 = vmatprep.subr.bf16.mxu1 %v379_v3  ;;  %v390_v10 = vld [vmem:[%s509_s1 + $0x30] ss:$8 sps:$4 sm:$0xff]   ;;  %v391_v11 = vld [vmem:[%s509_s1 + $0x24] ss:$8 sps:$4 sm:$0xff]   ;;  %v393_v12 = vld [vmem:[%s509_s1 + $0x20] ss:$8 sps:$4 sm:$0xff]  }
   0x5   :  { %v394_v13 = vld [vmem:[%s509_s1 + $0x14] ss:$8 sps:$4 sm:$0xff]   ;;  %v396_v14 = vld [vmem:[%s509_s1 + $0x10] ss:$8 sps:$4 sm:$0xff]   ;;  %v397_v15 = vld [vmem:[%s509_s1 + $0x4] ss:$8 sps:$4 sm:$0xff]  }
   0x6   :  { %v399_v16 = vld [vmem:[%s509_s1] ss:$8 sps:$4 sm:$0xff]   ;;  %v402_v19 = vld [vmem:[%s510_s0 + $0x10] sm:$0xff]  }
   0x7   :  { %164 = vmatpush1.bf16.msra.mxu0 %v381_v4  ;;  %367 = vmatpush1.bf16.msra.mxu1 %v381_v4  ;;  %v400_v17 = vld [vmem:[%s510_s0] sm:$0xff]   ;;  %v401_v18 = vld [vmem:[%s510_s0 + $0x8] sm:$0xff]  }
   0x8   :  { %165 = vmatprep.subr.bf16.mxu0 %v382_v5  ;;  %360 = vmatprep.subr.bf16.mxu1 %v382_v5 }
   0xb   :  { %166 = vmatpush1.bf16.msra.mxu0 %v384_v6  ;;  %368 = vmatpush1.bf16.msra.mxu1 %v384_v6 }
   0xc   :  { %167 = vmatprep.subr.bf16.mxu0 %v385_v7  ;;  %361 = vmatprep.subr.bf16.mxu1 %v385_v7 }
   0xf   :  { %168 = vmatpush1.bf16.msra.mxu0 %v387_v8  ;;  %369 = vmatpush1.bf16.msra.mxu1 %v387_v8 }
  0x10   :  { %169 = vmatprep.subr.bf16.mxu0 %v388_v9  ;;  %362 = vmatprep.subr.bf16.mxu1 %v388_v9 }
  0x13   :  { %170 = vmatpush1.bf16.msra.mxu0 %v390_v10  ;;  %370 = vmatpush1.bf16.msra.mxu1 %v390_v10 }
  0x14   :  { %171 = vmatprep.subr.bf16.mxu0 %v391_v11  ;;  %363 = vmatprep.subr.bf16.mxu1 %v391_v11 }
  0x17   :  { %172 = vmatpush1.bf16.msra.mxu0 %v393_v12  ;;  %371 = vmatpush1.bf16.msra.mxu1 %v393_v12 }
  0x18   :  { %173 = vmatprep.subr.bf16.mxu0 %v394_v13  ;;  %364 = vmatprep.subr.bf16.mxu1 %v394_v13 }
  0x1b   :  { %174 = vmatpush1.bf16.msra.mxu0 %v396_v14  ;;  %372 = vmatpush1.bf16.msra.mxu1 %v396_v14 }
  0x1c   :  { %175 = vmatprep.subr.bf16.mxu0 %v397_v15  ;;  %365 = vmatprep.subr.bf16.mxu1 %v397_v15 }
  0x1f   :  { %176 = vmatpush1.bf16.msra.mxu0 %v399_v16  ;;  %373 = vmatpush1.bf16.msra.mxu1 %v399_v16 }
  0x22   :  { %194 = vmatmul.mubr.bf16.vlgmr.msra.gmra.mxu0 %v400_v17  ;;  %204 = vmatmul.mubr.bf16.vlgmr.msra.gmra.mxu1 %v401_v18 }
  0x23   :  { %213 = vmatprep.mubr.bf16.mxu1 %v427_v1 }
  0x2a   :  { %214 = vmatmul.mubr.bf16.gmra.mxu1 %v402_v19 }
  0xe2   :  { %v195_v20 = vpop.f32.mrf.mxu0  ;;  %v205_v21 = vpop.f32.mrf.mxu1 }
  0xe3   :  { %v224_v22 = vmul.f32 %v195_v20, %v195_v20  ;;  %v226_v25 = vmul.f32 %v205_v21, %v205_v21 }
  0xe4   :  { %v197_v23 = vpop.f32.mrf.mxu0  ;;  %v207_v24 = vpop.f32.mrf.mxu1 }
  0xe5   :  { %v227_v26 = vmul.f32 %v197_v23, %v197_v23  ;;  %v229_v27 = vmul.f32 %v207_v24, %v207_v24 }
  0xe6   :  { %v199_v28 = vpop.f32.mrf.mxu0  ;;  %v209_v29 = vpop.f32.mrf.mxu1 }
  0xe7   :  { %v230_v30 = vadd.f32 %v227_v26, %v224_v22  ;;  %v232_v31 = vadd.f32 %v229_v27, %v226_v25  ;;  %v225_v34 = vmul.f32 %v199_v28, %v199_v28  ;;  %v233_v36 = vmul.f32 %v209_v29, %v209_v29 }
  0xe8   :  { %v201_v32 = vpop.f32.mrf.mxu0  ;;  %v211_v33 = vpop.f32.mrf.mxu1 }
  0xe9   :  { %403 = vrsqrt.f32 %v230_v30  ;;  %v228_v37 = vmul.f32 %v201_v32, %v201_v32  ;;  %v236_v38 = vmul.f32 %v211_v33, %v211_v33  ;;  %vm244_vm0 = vcmp.eq.f32.partialorder %v230_v30, inf }
  0xea   :  { %405 = vrsqrt.f32 %v232_v31  ;;  %v215_v35 = vpop.f32.mrf.mxu1  ;;  %v247_v57 = vand.u32 2147483648, %v230_v30  ;;  %vm246_vm1 = vcmp.eq.f32.partialorder %v230_v30, 0.0  ;;  %vm258_vm2 = vcmp.eq.f32.partialorder %v232_v31, inf }
  0xeb   :  { %v231_v40 = vadd.f32 %v228_v37, %v225_v34  ;;  %v239_v41 = vadd.f32 %v236_v38, %v233_v36  ;;  %v234_v44 = vmul.f32 %v215_v35, %v215_v35  ;;  %vm260_vm3 = vcmp.eq.f32.partialorder %v232_v31, 0.0 }
  0xec   :  { %v217_v39 = vpop.f32.mrf.mxu1  ;;  %v261_v62 = vand.u32 2147483648, %v232_v31 }
  0xed   :  { %v237_v42 = vmul.f32 %v217_v39, %v217_v39  ;;  %407 = vrsqrt.f32 %v231_v40  ;;  %vm251_vm4 = vcmp.eq.f32.partialorder %v231_v40, inf  ;;  %vm253_vm5 = vcmp.eq.f32.partialorder %v231_v40, 0.0 }
  0xee   :  { %v219_v43 = vpop.f32.mrf.mxu1  ;;  %409 = vrsqrt.f32 %v239_v41  ;;  %v254_v0 = vand.u32 2147483648, %v231_v40  ;;  %vm265_vm6 = vcmp.eq.f32.partialorder %v239_v41, inf  ;;  %v268_v4 = vand.u32 2147483648, %v239_v41 }
  0xef   :  { %v240_v46 = vadd.f32 %v237_v42, %v234_v44  ;;  %v235_v48 = vmul.f32 %v219_v43, %v219_v43  ;;  %vm267_vm7 = vcmp.eq.f32.partialorder %v239_v41, 0.0 }
  0xf0   :  { %v221_v45 = vpop.f32.mrf.mxu1 }
  0xf1   :  { %v238_v47 = vmul.f32 %v221_v45, %v221_v45  ;;  %411 = vrsqrt.f32 %v240_v46  ;;  %v320_v50 = vadd.f32 %v240_v46, %v239_v41  ;;  %vm272_vm8 = vcmp.eq.f32.partialorder %v240_v46, inf }
  0xf2   :  { %vm274_vm9 = vcmp.eq.f32.partialorder %v240_v46, 0.0  ;;  %v275_v13 = vand.u32 2147483648, %v240_v46 }
  0xf3   :  { %v241_v49 = vadd.f32 %v238_v47, %v235_v48 }
  0xf5   :  { %413 = vrsqrt.f32 %v241_v49  ;;  %v321_v54 = vadd.f32 %v320_v50, %v241_v49  ;;  %vm279_vm10 = vcmp.eq.f32.partialorder %v241_v49, inf  ;;  %v282_v22 = vand.u32 2147483648, %v241_v49 }
  0xf6   :  { %v404_v51 = vpop.eup %403  ;;  %vm281_vm11 = vcmp.eq.f32.partialorder %v241_v49, 0.0 }
  0xf7   :  { %v406_v52 = vpop.eup %405  ;;  %v243_v53 = vmul.f32 %v404_v51, %v230_v30  ;;  %323 = vst [vmem:[%s511_s2 + $0x8] sm:$0xff] %v321_v54 }
  0xf8   :  { %v257_v56 = vmul.f32 %v406_v52, %v232_v31 }
  0xf9   :  { %v245_v55 = vsel %vm244_vm0, %v230_v30, %v243_v53 }
  0xfa   :  { %v408_v58 = vpop.eup %407  ;;  %v248_v59 = vsel %vm246_vm1, %v247_v57, %v245_v55  ;;  %v259_v61 = vsel %vm258_vm2, %v232_v31, %v257_v56 }
  0xfb   :  { %v410_v60 = vpop.eup %409  ;;  %v250_v63 = vmul.f32 %v408_v58, %v231_v40  ;;  %v290_v2 = vadd.f32 1e-07, %v248_v59  ;;  %v262_v6 = vsel %vm260_vm3, %v261_v62, %v259_v61 }
  0xfc   :  { %v264_v1 = vmul.f32 %v410_v60, %v239_v41  ;;  %v292_v15 = vadd.f32 1e-07, %v262_v6 }
  0xfd   :  { %v252_v3 = vsel %vm251_vm4, %v231_v40, %v250_v63  ;;  %415 = vlog2.f32 %v290_v2 }
  0xfe   :  { %v412_v5 = vpop.eup %411  ;;  %v255_v7 = vsel %vm253_vm5, %v254_v0, %v252_v3  ;;  %v266_v8 = vsel %vm265_vm6, %v239_v41, %v264_v1 }
  0xff   :  { %v291_v9 = vadd.f32 1e-07, %v255_v7  ;;  %v269_v10 = vsel %vm267_vm7, %v268_v4, %v266_v8  ;;  %v271_v11 = vmul.f32 %v412_v5, %v240_v46 }
 0x100   :  { %v299_v12 = vadd.f32 1e-07, %v269_v10  ;;  %v284_v17 = vsub.f32 %v269_v10, %v248_v59 }
 0x101   :  { %v273_v16 = vsel %vm272_vm8, %v240_v46, %v271_v11 }
 0x102   :  { %v414_v14 = vpop.eup %413  ;;  %417 = vlog2.f32 %v299_v12  ;;  %v276_v18 = vsel %vm274_vm9, %v275_v13, %v273_v16  ;;  %v287_v26 = vmul.f32 %v284_v17, %v284_v17 }
 0x103   :  { %v278_v19 = vmul.f32 %v414_v14, %v241_v49  ;;  %419 = vlog2.f32 %v291_v9  ;;  %v285_v20 = vsub.f32 %v276_v18, %v255_v7  ;;  %v300_v21 = vadd.f32 1e-07, %v276_v18 }
 0x105   :  { %v280_v23 = vsel %vm279_vm10, %v241_v49, %v278_v19  ;;  %v288_v24 = vmul.f32 %v285_v20, %v285_v20  ;;  %421 = vlog2.f32 %v300_v21 }
 0x106   :  { %v283_v25 = vsel %vm281_vm11, %v282_v22, %v280_v23  ;;  %423 = vlog2.f32 %v292_v15 }
 0x107   :  { %v286_v27 = vsub.f32 %v283_v25, %v262_v6  ;;  %v301_v28 = vadd.f32 1e-07, %v283_v25  ;;  %v315_v29 = vadd.f32 %v288_v24, %v287_v26 }
 0x109   :  { %v289_v30 = vmul.f32 %v286_v27, %v286_v27  ;;  %425 = vlog2.f32 %v301_v28 }
 0x10a   :  { %v416_v32 = vpop.eup %415 }
 0x10b   :  { %v316_v31 = vadd.f32 %v315_v29, %v289_v30  ;;  %v294_v37 = vmul.f32 0.6931472, %v416_v32 }
 0x10d   :  { %318 = vst [vmem:[%s511_s2] sm:$0xff] %v316_v31 }
 0x10f   :  { %v418_v33 = vpop.eup %417 }
 0x110   :  { %v420_v34 = vpop.eup %419  ;;  %v303_v35 = vmul.f32 0.6931472, %v418_v33 }
 0x111   :  { %v296_v39 = vmul.f32 0.6931472, %v420_v34 }
 0x112   :  { %v422_v36 = vpop.eup %421  ;;  %v308_v41 = vsub.f32 %v294_v37, %v303_v35 }
 0x113   :  { %v424_v38 = vpop.eup %423  ;;  %v305_v40 = vmul.f32 0.6931472, %v422_v36 }
 0x114   :  { %v298_v44 = vmul.f32 0.6931472, %v424_v38  ;;  %v311_v47 = vand.u32 2147483647, %v308_v41 }
 0x115   :  { %v309_v43 = vsub.f32 %v296_v39, %v305_v40 }
 0x116   :  { %v426_v42 = vpop.eup %425 }
 0x117   :  { %v307_v45 = vmul.f32 0.6931472, %v426_v42  ;;  %v312_v46 = vand.u32 2147483647, %v309_v43 }
 0x119   :  { %v310_v48 = vsub.f32 %v298_v44, %v307_v45  ;;  %v325_v49 = vadd.f32 %v312_v46, %v311_v47 }
 0x11b   :  { %v313_v50 = vand.u32 2147483647, %v310_v48 }
 0x11d   :  { %v326_v51 = vadd.f32 %v325_v49, %v313_v50 }
 0x11f   :  { %328 = vst [vmem:[%s511_s2 + $0x10] sm:$0xff] %v326_v51 }

// kernel: multi_resolution_stft_loss.3
= control target key start
LH: loop header
LB: loop body
LE: loop exit
PB: predicated region body
PF: predicated region fallthrough
CT: control target
= control target key end

     0   :  { %v549_v1 = vmov 0   ;;  %s752_s1 = inlined_call_operand.vmem [shape: bf16[128,256], index: 1, kind: input, shape index: {}]   ;;  %s753_s0 = inlined_call_operand.vmem [shape: bf16[80,128], index: 0, kind: input, shape index: {}]   ;;  %s754_s2 = inlined_call_operand.vmem [shape: f32[24,128], index: 2, kind: output, shape index: {}]  }
   0x1   :  { %v480_v0 = vld [vmem:[%s752_s1 + $0x74] ss:$8 sps:$4 sm:$0xff]   ;;  %209 = vmatprep.mubr.bf16.mxu0 %v549_v1  ;;  %239 = vmatprep.mubr.bf16.mxu1 %v549_v1  ;;  %v482_v2 = vld [vmem:[%s752_s1 + $0x70] ss:$8 sps:$4 sm:$0xff]   ;;  %v483_v3 = vld [vmem:[%s752_s1 + $0x64] ss:$8 sps:$4 sm:$0xff]  }
   0x2   :  { %177 = vmatprep.subr.bf16.mxu0 %v480_v0  ;;  %462 = vmatprep.subr.bf16.mxu1 %v480_v0  ;;  %v485_v4 = vld [vmem:[%s752_s1 + $0x60] ss:$8 sps:$4 sm:$0xff]   ;;  %v486_v5 = vld [vmem:[%s752_s1 + $0x54] ss:$8 sps:$4 sm:$0xff]   ;;  %v488_v6 = vld [vmem:[%s752_s1 + $0x50] ss:$8 sps:$4 sm:$0xff]  }
   0x3   :  { %178 = vmatpush1.bf16.msra.mxu0 %v482_v2  ;;  %470 = vmatpush1.bf16.msra.mxu1 %v482_v2  ;;  %v489_v7 = vld [vmem:[%s752_s1 + $0x44] ss:$8 sps:$4 sm:$0xff]   ;;  %v491_v8 = vld [vmem:[%s752_s1 + $0x40] ss:$8 sps:$4 sm:$0xff]   ;;  %v492_v9 = vld [vmem:[%s752_s1 + $0x34] ss:$8 sps:$4 sm:$0xff]  }
   0x4   :  { %179 = vmatprep.subr.bf16.mxu0 %v483_v3  ;;  %463 = vmatprep.subr.bf16.mxu1 %v483_v3  ;;  %v494_v10 = vld [vmem:[%s752_s1 + $0x30] ss:$8 sps:$4 sm:$0xff]   ;;  %v495_v11 = vld [vmem:[%s752_s1 + $0x24] ss:$8 sps:$4 sm:$0xff]   ;;  %v497_v12 = vld [vmem:[%s752_s1 + $0x20] ss:$8 sps:$4 sm:$0xff]  }
   0x5   :  { %v498_v13 = vld [vmem:[%s752_s1 + $0x14] ss:$8 sps:$4 sm:$0xff]   ;;  %v500_v14 = vld [vmem:[%s752_s1 + $0x10] ss:$8 sps:$4 sm:$0xff]   ;;  %v501_v15 = vld [vmem:[%s752_s1 + $0x4] ss:$8 sps:$4 sm:$0xff]  }
   0x6   :  { %v503_v16 = vld [vmem:[%s752_s1] ss:$8 sps:$4 sm:$0xff]   ;;  %v505_v18 = vld [vmem:[%s753_s0 + $0x18] sm:$0xff]   ;;  %v508_v21 = vld [vmem:[%s753_s0 + $0x10] sm:$0xff]  }
   0x7   :  { %180 = vmatpush1.bf16.msra.mxu0 %v485_v4  ;;  %471 = vmatpush1.bf16.msra.mxu1 %v485_v4  ;;  %v504_v17 = vld [vmem:[%s753_s0] sm:$0xff]   ;;  %v506_v19 = vld [vmem:[%s753_s0 + $0x8] sm:$0xff]  }
   0x8   :  { %181 = vmatprep.subr.bf16.mxu0 %v486_v5  ;;  %464 = vmatprep.subr.bf16.mxu1 %v486_v5  ;;  %v507_v20 = vld [vmem:[%s753_s0 + $0x20] sm:$0xff]  }
   0xb   :  { %182 = vmatpush1.bf16.msra.mxu0 %v488_v6  ;;  %472 = vmatpush1.bf16.msra.mxu1 %v488_v6 }
   0xc   :  { %183 = vmatprep.subr.bf16.mxu0 %v489_v7  ;;  %465 = vmatprep.subr.bf16.mxu1 %v489_v7 }
   0xf   :  { %184 = vmatpush1.bf16.msra.mxu0 %v491_v8  ;;  %473 = vmatpush1.bf16.msra.mxu1 %v491_v8 }
  0x10   :  { %185 = vmatprep.subr.bf16.mxu0 %v492_v9  ;;  %466 = vmatprep.subr.bf16.mxu1 %v492_v9 }
  0x13   :  { %186 = vmatpush1.bf16.msra.mxu0 %v494_v10  ;;  %474 = vmatpush1.bf16.msra.mxu1 %v494_v10 }
  0x14   :  { %187 = vmatprep.subr.bf16.mxu0 %v495_v11  ;;  %467 = vmatprep.subr.bf16.mxu1 %v495_v11 }
  0x17   :  { %188 = vmatpush1.bf16.msra.mxu0 %v497_v12  ;;  %475 = vmatpush1.bf16.msra.mxu1 %v497_v12 }
  0x18   :  { %189 = vmatprep.subr.bf16.mxu0 %v498_v13  ;;  %468 = vmatprep.subr.bf16.mxu1 %v498_v13 }
  0x1b   :  { %190 = vmatpush1.bf16.msra.mxu0 %v500_v14  ;;  %476 = vmatpush1.bf16.msra.mxu1 %v500_v14 }
  0x1c   :  { %191 = vmatprep.subr.bf16.mxu0 %v501_v15  ;;  %469 = vmatprep.subr.bf16.mxu1 %v501_v15 }
  0x1f   :  { %192 = vmatpush1.bf16.msra.mxu0 %v503_v16  ;;  %477 = vmatpush1.bf16.msra.mxu1 %v503_v16 }
  0x22   :  { %210 = vmatmul.mubr.bf16.vlgmr.msra.gmra.mxu0 %v504_v17  ;;  %240 = vmatmul.mubr.bf16.vlgmr.msra.gmra.mxu1 %v505_v18 }
  0x23   :  { %219 = vmatprep.mubr.bf16.mxu0 %v549_v1  ;;  %249 = vmatprep.mubr.bf16.mxu1 %v549_v1 }
  0x2a   :  { %220 = vmatmul.mubr.bf16.gmra.mxu0 %v506_v19  ;;  %250 = vmatmul.mubr.bf16.gmra.mxu1 %v507_v20 }
  0x2b   :  { %229 = vmatprep.mubr.bf16.mxu0 %v549_v1 }
  0x32   :  { %230 = vmatmul.mubr.bf16.gmra.mxu0 %v508_v21 }
  0xe2   :  { %v211_v22 = vpop.f32.mrf.mxu0  ;;  %v241_v23 = vpop.f32.mrf.mxu1 }
  0xe3   :  { %v260_v27 = vmul.f32 %v211_v22, %v211_v22  ;;  %v276_v28 = vmul.f32 %v241_v23, %v241_v23 }
  0xe4   :  { %v213_v24 = vpop.f32.mrf.mxu0  ;;  %v243_v25 = vpop.f32.mrf.mxu1 }
  0xe5   :  { %v265_v26 = vmul.f32 %v213_v24, %v213_v24  ;;  %v281_v29 = vmul.f32 %v243_v25, %v243_v25 }
  0xe6   :  { %v215_v30 = vpop.f32.mrf.mxu0  ;;  %v245_v31 = vpop.f32.mrf.mxu1 }
  0xe7   :  { %v628_v32 = vadd.f32 %v265_v26, %v260_v27  ;;  %v277_v35 = vmul.f32 %v245_v31, %v245_v31  ;;  %v630_v36 = vadd.f32 %v281_v29, %v276_v28  ;;  %v261_v37 = vmul.f32 %v215_v30, %v215_v30 }
  0xe8   :  { %v217_v33 = vpop.f32.mrf.mxu0  ;;  %v247_v34 = vpop.f32.mrf.mxu1 }
  0xe9   :  { %v266_v38 = vmul.f32 %v217_v33, %v217_v33  ;;  %v282_v41 = vmul.f32 %v247_v34, %v247_v34  ;;  %509 = vrsqrt.f32 %v628_v32  ;;  %vm292_vm0 = vcmp.eq.f32.partialorder %v628_v32, inf }
  0xea   :  { %v221_v39 = vpop.f32.mrf.mxu0  ;;  %v251_v40 = vpop.f32.mrf.mxu1  ;;  %511 = vrsqrt.f32 %v630_v36  ;;  %vm294_vm1 = vcmp.eq.f32.partialorder %v628_v32, 0.0  ;;  %v295_v13 = vand.u32 2147483648, %v628_v32  ;;  %vm334_vm2 = vcmp.eq.f32.partialorder %v630_v36, inf }
  0xeb   :  { %v633_v42 = vadd.f32 %v266_v38, %v261_v37  ;;  %v278_v43 = vmul.f32 %v251_v40, %v251_v40  ;;  %v635_v46 = vadd.f32 %v282_v41, %v277_v35  ;;  %v262_v47 = vmul.f32 %v221_v39, %v221_v39 }
  0xec   :  { %v223_v44 = vpop.f32.mrf.mxu0  ;;  %v253_v45 = vpop.f32.mrf.mxu1  ;;  %v337_v14 = vand.u32 2147483648, %v630_v36  ;;  %vm336_vm3 = vcmp.eq.f32.partialorder %v630_v36, 0.0 }
  0xed   :  { %v267_v48 = vmul.f32 %v223_v44, %v223_v44  ;;  %v283_v49 = vmul.f32 %v253_v45, %v253_v45  ;;  %513 = vrsqrt.f32 %v633_v42  ;;  %vm299_vm4 = vcmp.eq.f32.partialorder %v633_v42, inf }
  0xee   :  { %v225_v50 = vpop.f32.mrf.mxu0  ;;  %v255_v51 = vpop.f32.mrf.mxu1  ;;  %515 = vrsqrt.f32 %v635_v46  ;;  %vm301_vm5 = vcmp.eq.f32.partialorder %v633_v42, 0.0  ;;  %v302_v17 = vand.u32 2147483648, %v633_v42  ;;  %vm341_vm6 = vcmp.eq.f32.partialorder %v635_v46, inf }
  0xef   :  { %v639_v52 = vadd.f32 %v267_v48, %v262_v47  ;;  %v642_v53 = vadd.f32 %v283_v49, %v278_v43  ;;  %v279_v56 = vmul.f32 %v255_v51, %v255_v51  ;;  %v263_v57 = vmul.f32 %v225_v50, %v225_v50 }
  0xf0   :  { %v227_v54 = vpop.f32.mrf.mxu0  ;;  %v257_v55 = vpop.f32.mrf.mxu1  ;;  %v344_v20 = vand.u32 2147483648, %v635_v46  ;;  %vm343_vm8 = vcmp.eq.f32.partialorder %v635_v46, 0.0 }
  0xf1   :  { %517 = vrsqrt.f32 %v639_v52  ;;  %v268_v58 = vmul.f32 %v227_v54, %v227_v54  ;;  %v284_v60 = vmul.f32 %v257_v55, %v257_v55  ;;  %vm306_vm7 = vcmp.eq.f32.partialorder %v639_v52, inf }
  0xf2   :  { %519 = vrsqrt.f32 %v642_v53  ;;  %v231_v59 = vpop.f32.mrf.mxu0  ;;  %vm308_vm9 = vcmp.eq.f32.partialorder %v639_v52, 0.0  ;;  %v309_v24 = vand.u32 2147483648, %v639_v52  ;;  %vm348_vm10 = vcmp.eq.f32.partialorder %v642_v53, inf }
  0xf3   :  { %v646_v61 = vadd.f32 %v268_v58, %v263_v57  ;;  %v648_v63 = vadd.f32 %v284_v60, %v279_v56  ;;  %v264_v1 = vmul.f32 %v231_v59, %v231_v59  ;;  %v351_v28 = vand.u32 2147483648, %v642_v53 }
  0xf4   :  { %v233_v62 = vpop.f32.mrf.mxu0  ;;  %vm350_vm12 = vcmp.eq.f32.partialorder %v642_v53, 0.0 }
  0xf5   :  { %v269_v0 = vmul.f32 %v233_v62, %v233_v62  ;;  %521 = vrsqrt.f32 %v646_v61  ;;  %vm313_vm11 = vcmp.eq.f32.partialorder %v646_v61, inf  ;;  %vm315_vm13 = vcmp.eq.f32.partialorder %v646_v61, 0.0 }
  0xf6   :  { %v235_v2 = vpop.f32.mrf.mxu0  ;;  %523 = vrsqrt.f32 %v648_v63  ;;  %v510_v5 = vpop.eup %509  ;;  %v316_v39 = vand.u32 2147483648, %v646_v61  ;;  %vm355_vm14 = vcmp.eq.f32.partialorder %v648_v63, inf }
  0xf7   :  { %v652_v3 = vadd.f32 %v269_v0, %v264_v1  ;;  %v275_v7 = vmul.f32 %v235_v2, %v235_v2  ;;  %v512_v8 = vpop.eup %511  ;;  %v291_v10 = vmul.f32 %v510_v5, %v628_v32  ;;  %v358_v0 = vand.u32 2147483648, %v648_v63 }
  0xf8   :  { %v237_v4 = vpop.f32.mrf.mxu0  ;;  %v333_v16 = vmul.f32 %v512_v8, %v630_v36 }
  0xf9   :  { %v280_v6 = vmul.f32 %v237_v4, %v237_v4  ;;  %525 = vrsqrt.f32 %v652_v3  ;;  %v293_v21 = vsel %vm292_vm0, %v628_v32, %v291_v10  ;;  %vm320_vm15 = vcmp.eq.f32.partialorder %v652_v3, inf }
  0xfa   :  { %v514_v9 = vpop.eup %513  ;;  %v335_v26 = vsel %vm334_vm2, %v630_v36, %v333_v16  ;;  %v296_v30 = vsel %vm294_vm1, %v295_v13, %v293_v21  ;;  %vm322_vm0 = vcmp.eq.f32.partialorder %v652_v3, 0.0  ;;  %v323_v54 = vand.u32 2147483648, %v652_v3 }
  0xfb   :  { %v658_v11 = vadd.f32 %v280_v6, %v275_v7  ;;  %v516_v12 = vpop.eup %515  ;;  %v298_v19 = vmul.f32 %v514_v9, %v633_v42  ;;  %v338_v37 = vsel %vm336_vm3, %v337_v14, %v335_v26  ;;  %v370_v40 = vadd.f32 1e-07, %v296_v30 }
  0xfc   :  { %v340_v22 = vmul.f32 %v516_v12, %v635_v46  ;;  %vm357_vm1 = vcmp.eq.f32.partialorder %v648_v63, 0.0 }
  0xfd   :  { %527 = vrsqrt.f32 %v658_v11  ;;  %v418_v25 = vadd.f32 %v630_v36, %v658_v11  ;;  %v300_v31 = vsel %vm299_vm4, %v633_v42, %v298_v19  ;;  %v386_v42 = vadd.f32 1e-07, %v338_v37 }
  0xfe   :  { %v518_v15 = vpop.eup %517  ;;  %v342_v34 = vsel %vm341_vm6, %v635_v46, %v340_v22  ;;  %v303_v41 = vsel %vm301_vm5, %v302_v17, %v300_v31  ;;  %529 = vlog2.f32 %v370_v40  ;;  %vm327_vm2 = vcmp.eq.f32.partialorder %v658_v11, inf }
  0xff   :  { %v520_v18 = vpop.eup %519  ;;  %v305_v23 = vmul.f32 %v518_v15, %v639_v52  ;;  %v419_v32 = vadd.f32 %v418_v25, %v635_v46  ;;  %v345_v45 = vsel %vm343_vm8, %v344_v20, %v342_v34  ;;  %v371_v51 = vadd.f32 1e-07, %v303_v41 }
 0x100   :  { %v347_v27 = vmul.f32 %v520_v18, %v642_v53  ;;  %v387_v56 = vadd.f32 1e-07, %v345_v45  ;;  %531 = vlog2.f32 %v386_v42  ;;  %v330_v4 = vand.u32 2147483648, %v658_v11 }
 0x101   :  { %v307_v38 = vsel %vm306_vm7, %v639_v52, %v305_v23  ;;  %v420_v44 = vadd.f32 %v419_v32, %v642_v53  ;;  %533 = vlog2.f32 %v371_v51  ;;  %v361_v5 = vsub.f32 %v338_v37, %v303_v41 }
 0x102   :  { %v522_v29 = vpop.eup %521  ;;  %v349_v43 = vsel %vm348_vm10, %v642_v53, %v347_v27  ;;  %v310_v49 = vsel %vm308_vm9, %v309_v24, %v307_v38  ;;  %535 = vlog2.f32 %v387_v56  ;;  %vm329_vm3 = vcmp.eq.f32.partialorder %v658_v11, 0.0 }
 0x103   :  { %v524_v33 = vpop.eup %523  ;;  %v312_v35 = vmul.f32 %v522_v29, %v646_v61  ;;  %v352_v46 = vsel %vm350_vm12, %v351_v28, %v349_v43  ;;  %v421_v55 = vadd.f32 %v420_v44, %v648_v63  ;;  %v372_v58 = vadd.f32 1e-07, %v310_v49 }
 0x104   :  { %v354_v48 = vmul.f32 %v524_v33, %v648_v63  ;;  %v388_v53 = vadd.f32 1e-07, %v352_v46  ;;  %v366_v12 = vmul.f32 %v361_v5, %v361_v5 }
 0x105   :  { %v314_v47 = vsel %vm313_vm11, %v646_v61, %v312_v35  ;;  %423 = vst [vmem:[%s754_s2 + $0x8] sm:$0xff] %v421_v55  ;;  %537 = vlog2.f32 %v372_v58 }
 0x106   :  { %v526_v36 = vpop.eup %525  ;;  %v317_v57 = vsel %vm315_vm13, %v316_v39, %v314_v47  ;;  %v356_v59 = vsel %vm355_vm14, %v648_v63, %v354_v48  ;;  %v362_v63 = vsub.f32 %v345_v45, %v310_v49  ;;  %539 = vlog2.f32 %v388_v53 }
 0x107   :  { %v319_v50 = vmul.f32 %v526_v36, %v652_v3  ;;  %v373_v1 = vadd.f32 1e-07, %v317_v57  ;;  %v359_v2 = vsel %vm357_vm1, %v358_v0, %v356_v59  ;;  %v363_v13 = vsub.f32 %v352_v46, %v317_v57 }
 0x108   :  { %v389_v8 = vadd.f32 1e-07, %v359_v2  ;;  %v367_v15 = vmul.f32 %v362_v63, %v362_v63 }
 0x109   :  { %v321_v52 = vsel %vm320_vm15, %v652_v3, %v319_v50  ;;  %541 = vlog2.f32 %v373_v1  ;;  %v368_v19 = vmul.f32 %v363_v13, %v363_v13 }
 0x10a   :  { %v324_v60 = vsel %vm322_vm0, %v323_v54, %v321_v52  ;;  %v528_v62 = vpop.eup %527 }
 0x10b   :  { %v326_v61 = vmul.f32 %v528_v62, %v658_v11  ;;  %v374_v3 = vadd.f32 1e-07, %v324_v60  ;;  %v364_v16 = vsub.f32 %v359_v2, %v324_v60  ;;  %v530_v18 = vpop.eup %529 }
 0x10c   :  { %v376_v35 = vmul.f32 0.6931472, %v530_v18 }
 0x10d   :  { %v328_v6 = vsel %vm327_vm2, %v658_v11, %v326_v61  ;;  %543 = vlog2.f32 %v374_v3  ;;  %v532_v11 = vpop.eup %531  ;;  %v369_v21 = vmul.f32 %v364_v16, %v364_v16 }
 0x10e   :  { %v331_v7 = vsel %vm329_vm3, %v330_v4, %v328_v6  ;;  %v534_v23 = vpop.eup %533  ;;  %v393_v31 = vmul.f32 0.6931472, %v532_v11 }
 0x10f   :  { %v360_v9 = vsub.f32 %v331_v7, %v296_v30  ;;  %v385_v10 = vadd.f32 1e-07, %v331_v7  ;;  %v536_v24 = vpop.eup %535  ;;  %v378_v28 = vmul.f32 0.6931472, %v534_v23 }
 0x110   :  { %v395_v37 = vmul.f32 0.6931472, %v536_v24 }
 0x111   :  { %v365_v14 = vmul.f32 %v360_v9, %v360_v9  ;;  %545 = vlog2.f32 %v385_v10  ;;  %v401_v32 = vsub.f32 %v378_v28, %v393_v31 }
 0x112   :  { %547 = vlog2.f32 %v389_v8  ;;  %v538_v26 = vpop.eup %537 }
 0x113   :  { %v411_v17 = vadd.f32 %v366_v12, %v365_v14  ;;  %v540_v27 = vpop.eup %539  ;;  %v380_v33 = vmul.f32 0.6931472, %v538_v26  ;;  %v406_v45 = vand.u32 2147483647, %v401_v32 }
 0x114   :  { %v397_v43 = vmul.f32 0.6931472, %v540_v27 }
 0x115   :  { %v412_v20 = vadd.f32 %v411_v17, %v367_v15  ;;  %v402_v41 = vsub.f32 %v380_v33, %v395_v37 }
 0x116   :  { %v542_v29 = vpop.eup %541 }
 0x117   :  { %v413_v22 = vadd.f32 %v412_v20, %v368_v19  ;;  %v382_v38 = vmul.f32 0.6931472, %v542_v29  ;;  %v407_v49 = vand.u32 2147483647, %v402_v41 }
 0x119   :  { %v414_v25 = vadd.f32 %v413_v22, %v369_v21  ;;  %v403_v47 = vsub.f32 %v382_v38, %v397_v43 }
 0x11a   :  { %v544_v30 = vpop.eup %543 }
 0x11b   :  { %416 = vst [vmem:[%s754_s2] sm:$0xff] %v414_v25  ;;  %v384_v44 = vmul.f32 0.6931472, %v544_v30  ;;  %v408_v46 = vand.u32 2147483647, %v403_v47 }
 0x11e   :  { %v546_v34 = vpop.eup %545 }
 0x11f   :  { %v391_v39 = vmul.f32 0.6931472, %v546_v34  ;;  %v548_v40 = vpop.eup %547 }
 0x120   :  { %v399_v48 = vmul.f32 0.6931472, %v548_v40 }
 0x121   :  { %v400_v36 = vsub.f32 %v376_v35, %v391_v39 }
 0x122   :  { %v404_v50 = vsub.f32 %v384_v44, %v399_v48 }
 0x123   :  { %v405_v42 = vand.u32 2147483647, %v400_v36 }
 0x124   :  { %v409_v55 = vand.u32 2147483647, %v404_v50 }
 0x125   :  { %v425_v51 = vadd.f32 %v406_v45, %v405_v42 }
 0x127   :  { %v426_v54 = vadd.f32 %v425_v51, %v407_v49 }
 0x129   :  { %v427_v56 = vadd.f32 %v426_v54, %v408_v46 }
 0x12b   :  { %v428_v57 = vadd.f32 %v427_v56, %v409_v55 }
 0x12d   :  { %430 = vst [vmem:[%s754_s2 + $0x10] sm:$0xff] %v428_v57 }

// kernel: multi_resolution_stft_loss.5
= control target key start
LH: loop header
LB: loop body
LE: loop exit
PB: predicated region body
PF: predicated region fallthrough
CT: control target
= control target key end

     0   :  { %v793_v1 = vmov 0   ;;  %s1185_s1 = inlined_call_operand.vmem [shape: bf16[128,256], index: 1, kind: input, shape index: {}]   ;;  %s1186_s0 = inlined_call_operand.vmem [shape: bf16[144,128], index: 0, kind: input, shape index: {}]   ;;  %s1187_s2 = inlined_call_operand.vmem [shape: f32[24,128], index: 2, kind: output, shape index: {}]  }
   0x1   :  { %v688_v0 = vld [vmem:[%s1185_s1 + $0x74] ss:$8 sps:$4 sm:$0xff]   ;;  %241 = vmatprep.mubr.bf16.mxu0 %v793_v1  ;;  %291 = vmatprep.mubr.bf16.mxu1 %v793_v1  ;;  %v690_v2 = vld [vmem:[%s1185_s1 + $0x70] ss:$8 sps:$4 sm:$0xff]   ;;  %v691_v3 = vld [vmem:[%s1185_s1 + $0x64] ss:$8 sps:$4 sm:$0xff]  }
   0x2   :  { %209 = vmatprep.subr.bf16.mxu0 %v688_v0  ;;  %670 = vmatprep.subr.bf16.mxu1 %v688_v0  ;;  %v693_v4 = vld [vmem:[%s1185_s1 + $0x60] ss:$8 sps:$4 sm:$0xff]   ;;  %v694_v5 = vld [vmem:[%s1185_s1 + $0x54] ss:$8 sps:$4 sm:$0xff]   ;;  %v696_v6 = vld [vmem:[%s1185_s1 + $0x50] ss:$8 sps:$4 sm:$0xff]  }
   0x3   :  { %210 = vmatpush1.bf16.msra.mxu0 %v690_v2  ;;  %678 = vmatpush1.bf16.msra.mxu1 %v690_v2  ;;  %v697_v7 = vld [vmem:[%s1185_s1 + $0x44] ss:$8 sps:$4 sm:$0xff]   ;;  %v699_v8 = vld [vmem:[%s1185_s1 + $0x40] ss:$8 sps:$4 sm:$0xff]   ;;  %v700_v9 = vld [vmem:[%s1185_s1 + $0x34] ss:$8 sps:$4 sm:$0xff]  }
   0x4   :  { %211 = vmatprep.subr.bf16.mxu0 %v691_v3  ;;  %671 = vmatprep.subr.bf16.mxu1 %v691_v3  ;;  %v702_v10 = vld [vmem:[%s1185_s1 + $0x30] ss:$8 sps:$4 sm:$0xff]   ;;  %v703_v11 = vld [vmem:[%s1185_s1 + $0x24] ss:$8 sps:$4 sm:$0xff]   ;;  %v705_v12 = vld [vmem:[%s1185_s1 + $0x20] ss:$8 sps:$4 sm:$0xff]  }
   0x5   :  { %v706_v13 = vld [vmem:[%s1185_s1 + $0x14] ss:$8 sps:$4 sm:$0xff]   ;;  %v708_v14 = vld [vmem:[%s1185_s1 + $0x10] ss:$8 sps:$4 sm:$0xff]   ;;  %v709_v15 = vld [vmem:[%s1185_s1 + $0x4] ss:$8 sps:$4 sm:$0xff]  }
   0x6   :  { %v711_v16 = vld [vmem:[%s1185_s1] ss:$8 sps:$4 sm:$0xff]   ;;  %v715_v20 = vld [vmem:[%s1186_s0 + $0x30] sm:$0xff]   ;;  %v717_v22 = vld [vmem:[%s1186_s0 + $0x38] sm:$0xff]  }
   0x7   :  { %212 = vmatpush1.bf16.msra.mxu0 %v693_v4  ;;  %679 = vmatpush1.bf16.msra.mxu1 %v693_v4  ;;  %v712_v17 = vld [vmem:[%s1186_s0] sm:$0xff]   ;;  %v713_v18 = vld [vmem:[%s1186_s0 + $0x28] sm:$0xff]   ;;  %v716_v21 = vld [vmem:[%s1186_s0 + $0x10] sm:$0xff]  }
   0x8   :  { %213 = vmatprep.subr.bf16.mxu0 %v694_v5  ;;  %672 = vmatprep.subr.bf16.mxu1 %v694_v5  ;;  %v714_v19 = vld [vmem:[%s1186_s0 + $0x8] sm:$0xff]   ;;  %v718_v23 = vld [vmem:[%s1186_s0 + $0x18] sm:$0xff]   ;;  %v719_v24 = vld [vmem:[%s1186_s0 + $0x40] sm:$0xff]  }
   0x9   :  { %v720_v25 = vld [vmem:[%s1186_s0 + $0x20] sm:$0xff]  }
   0xb   :  { %214 = vmatpush1.bf16.msra.mxu0 %v696_v6  ;;  %680 = vmatpush1.bf16.msra.mxu1 %v696_v6 }
   0xc   :  { %215 = vmatprep.subr.bf16.mxu0 %v697_v7  ;;  %673 = vmatprep.subr.bf16.mxu1 %v697_v7 }
   0xf   :  { %216 = vmatpush1.bf16.msra.mxu0 %v699_v8  ;;  %681 = vmatpush1.bf16.msra.mxu1 %v699_v8 }
  0x10   :  { %217 = vmatprep.subr.bf16.mxu0 %v700_v9  ;;  %674 = vmatprep.subr.bf16.mxu1 %v700_v9 }
  0x13   :  { %218 = vmatpush1.bf16.msra.mxu0 %v702_v10  ;;  %682 = vmatpush1.bf16.msra.mxu1 %v702_v10 }
  0x14   :  { %219 = vmatprep.subr.bf16.mxu0 %v703_v11  ;;  %675 = vmatprep.subr.bf16.mxu1 %v703_v11 }
  0x17   :  { %220 = vmatpush1.bf16.msra.mxu0 %v705_v12  ;;  %683 = vmatpush1.bf16.msra.mxu1 %v705_v12 }
  0x18   :  { %221 = vmatprep.subr.bf16.mxu0 %v706_v13  ;;  %676 = vmatprep.subr.bf16.mxu1 %v706_v13 }
  0x1b   :  { %222 = vmatpush1.bf16.msra.mxu0 %v708_v14  ;;  %684 = vmatpush1.bf16.msra.mxu1 %v708_v14 }
  0x1c   :  { %223 = vmatprep.subr.bf16.mxu0 %v709_v15  ;;  %677 = vmatprep.subr.bf16.mxu1 %v709_v15 }
  0x1f   :  { %224 = vmatpush1.bf16.msra.mxu0 %v711_v16  ;;  %685 = vmatpush1.bf16.msra.mxu1 %v711_v16 }
  0x22   :  { %242 = vmatmul.mubr.bf16.vlgmr.msra.gmra.mxu0 %v712_v17  ;;  %292 = vmatmul.mubr.bf16.vlgmr.msra.gmra.mxu1 %v713_v18 }
  0x23   :  { %251 = vmatprep.mubr.bf16.mxu0 %v793_v1  ;;  %301 = vmatprep.mubr.bf16.mxu1 %v793_v1 }
  0x2a   :  { %252 = vmatmul.mubr.bf16.gmra.mxu0 %v714_v19  ;;  %302 = vmatmul.mubr.bf16.gmra.mxu1 %v715_v20 }
  0x2b   :  { %261 = vmatprep.mubr.bf16.mxu0 %v793_v1  ;;  %311 = vmatprep.mubr.bf16.mxu1 %v793_v1 }
  0x32   :  { %262 = vmatmul.mubr.bf16.gmra.mxu0 %v716_v21  ;;  %312 = vmatmul.mubr.bf16.gmra.mxu1 %v717_v22 }
  0x33   :  { %271 = vmatprep.mubr.bf16.mxu0 %v793_v1  ;;  %321 = vmatprep.mubr.bf16.mxu1 %v793_v1 }
  0x3a   :  { %272 = vmatmul.mubr.bf16.gmra.mxu0 %v718_v23  ;;  %322 = vmatmul.mubr.bf16.gmra.mxu1 %v719_v24 }
  0x3b   :  { %281 = vmatprep.mubr.bf16.mxu0 %v793_v1 }
  0x42   :  { %282 = vmatmul.mubr.bf16.gmra.mxu0 %v720_v25 }
  0xe2   :  { %v243_v26 = vpop.f32.mrf.mxu0  ;;  %v293_v27 = vpop.f32.mrf.mxu1 }
  0xe3   :  { %v332_v41 = vmul.f32 %v243_v26, %v243_v26  ;;  %v360_v42 = vmul.f32 %v293_v27, %v293_v27 }
  0xe4   :  { %v245_v28 = vpop.f32.mrf.mxu0  ;;  %v295_v29 = vpop.f32.mrf.mxu1 }
  0xe5   :  { %v341_v38 = vmul.f32 %v245_v28, %v245_v28  ;;  %v369_v43 = vmul.f32 %v295_v29, %v295_v29 }
  0xe6   :  { %v247_v30 = vpop.f32.mrf.mxu0  ;;  %v297_v31 = vpop.f32.mrf.mxu1 }
  0xe7   :  { %v893_v45 = vadd.f32 %v341_v38, %v332_v41  ;;  %v895_v48 = vadd.f32 %v369_v43, %v360_v42  ;;  %v333_v54 = vmul.f32 %v247_v30, %v247_v30  ;;  %v361_v55 = vmul.f32 %v297_v31, %v297_v31 }
  0xe8   :  { %v249_v32 = vpop.f32.mrf.mxu0  ;;  %v299_v33 = vpop.f32.mrf.mxu1 }
  0xe9   :  { %721 = vrsqrt.f32 %v893_v45  ;;  %v342_v52 = vmul.f32 %v249_v32, %v249_v32  ;;  %v370_v56 = vmul.f32 %v299_v33, %v299_v33  ;;  %vm388_vm0 = vcmp.eq.f32.partialorder %v893_v45, inf }
  0xea   :  { %v253_v34 = vpop.f32.mrf.mxu0  ;;  %v303_v35 = vpop.f32.mrf.mxu1  ;;  %723 = vrsqrt.f32 %v895_v48  ;;  %vm458_vm1 = vcmp.eq.f32.partialorder %v895_v48, inf  ;;  %v391_v31 = vand.u32 2147483648, %v893_v45  ;;  %vm390_vm2 = vcmp.eq.f32.partialorder %v893_v45, 0.0 }
  0xeb   :  { %v901_v60 = vadd.f32 %v342_v52, %v333_v54  ;;  %v334_v61 = vmul.f32 %v253_v34, %v253_v34  ;;  %v905_v63 = vadd.f32 %v370_v56, %v361_v55  ;;  %v362_v0 = vmul.f32 %v303_v35, %v303_v35 }
  0xec   :  { %v255_v36 = vpop.f32.mrf.mxu0  ;;  %v305_v37 = vpop.f32.mrf.mxu1  ;;  %v461_v34 = vand.u32 2147483648, %v895_v48  ;;  %vm460_vm3 = vcmp.eq.f32.partialorder %v895_v48, 0.0 }
  0xed   :  { %v343_v59 = vmul.f32 %v255_v36, %v255_v36  ;;  %v371_v1 = vmul.f32 %v305_v37, %v305_v37  ;;  %725 = vrsqrt.f32 %v901_v60  ;;  %vm395_vm4 = vcmp.eq.f32.partialorder %v901_v60, inf }
  0xee   :  { %v257_v39 = vpop.f32.mrf.mxu0  ;;  %v307_v40 = vpop.f32.mrf.mxu1  ;;  %727 = vrsqrt.f32 %v905_v63  ;;  %v398_v38 = vand.u32 2147483648, %v901_v60  ;;  %vm397_vm5 = vcmp.eq.f32.partialorder %v901_v60, 0.0  ;;  %vm465_vm6 = vcmp.eq.f32.partialorder %v905_v63, inf }
  0xef   :  { %v907_v3 = vadd.f32 %v343_v59, %v334_v61  ;;  %v335_v6 = vmul.f32 %v257_v39, %v257_v39  ;;  %v913_v11 = vadd.f32 %v371_v1, %v362_v0  ;;  %v363_v15 = vmul.f32 %v307_v40, %v307_v40 }
  0xf0   :  { %v259_v44 = vpop.f32.mrf.mxu0  ;;  %v309_v46 = vpop.f32.mrf.mxu1  ;;  %v468_v41 = vand.u32 2147483648, %v905_v63  ;;  %vm467_vm8 = vcmp.eq.f32.partialorder %v905_v63, 0.0 }
  0xf1   :  { %v344_v4 = vmul.f32 %v259_v44, %v259_v44  ;;  %729 = vrsqrt.f32 %v907_v3  ;;  %v372_v16 = vmul.f32 %v309_v46, %v309_v46  ;;  %vm402_vm7 = vcmp.eq.f32.partialorder %v907_v3, inf }
  0xf2   :  { %v263_v47 = vpop.f32.mrf.mxu0  ;;  %v313_v50 = vpop.f32.mrf.mxu1  ;;  %731 = vrsqrt.f32 %v913_v11  ;;  %v405_v46 = vand.u32 2147483648, %v907_v3  ;;  %vm472_vm9 = vcmp.eq.f32.partialorder %v913_v11, inf  ;;  %vm404_vm10 = vcmp.eq.f32.partialorder %v907_v3, 0.0 }
  0xf3   :  { %v364_v7 = vmul.f32 %v313_v50, %v313_v50  ;;  %v336_v12 = vmul.f32 %v263_v47, %v263_v47  ;;  %v916_v14 = vadd.f32 %v344_v4, %v335_v6  ;;  %v928_v25 = vadd.f32 %v372_v16, %v363_v15 }
  0xf4   :  { %v265_v49 = vpop.f32.mrf.mxu0  ;;  %v315_v57 = vpop.f32.mrf.mxu1  ;;  %v475_v50 = vand.u32 2147483648, %v913_v11  ;;  %vm474_vm12 = vcmp.eq.f32.partialorder %v913_v11, 0.0 }
  0xf5   :  { %v345_v5 = vmul.f32 %v265_v49, %v265_v49  ;;  %v373_v8 = vmul.f32 %v315_v57, %v315_v57  ;;  %733 = vrsqrt.f32 %v916_v14  ;;  %vm409_vm11 = vcmp.eq.f32.partialorder %v916_v14, inf }
  0xf6   :  { %v267_v51 = vpop.f32.mrf.mxu0  ;;  %v317_v2 = vpop.f32.mrf.mxu1  ;;  %vm411_vm15 = vcmp.eq.f32.partialorder %v916_v14, 0.0 }
  0xf7   :  { %v722_v10 = vpop.eup %721  ;;  %v918_v17 = vadd.f32 %v345_v5, %v336_v12  ;;  %v921_v20 = vadd.f32 %v373_v8, %v364_v7  ;;  %v337_v26 = vmul.f32 %v267_v51, %v267_v51  ;;  %v365_v28 = vmul.f32 %v317_v2, %v317_v2 }
  0xf8   :  { %v269_v53 = vpop.f32.mrf.mxu0  ;;  %v319_v13 = vpop.f32.mrf.mxu1  ;;  %v387_v19 = vmul.f32 %v722_v10, %v893_v45  ;;  %v412_v51 = vand.u32 2147483648, %v916_v14 }
  0xf9   :  { %v724_v18 = vpop.eup %723  ;;  %v346_v22 = vmul.f32 %v269_v53, %v269_v53  ;;  %735 = vrsqrt.f32 %v918_v17  ;;  %v374_v29 = vmul.f32 %v319_v13, %v319_v13  ;;  %v482_v53 = vand.u32 2147483648, %v928_v25 }
  0xfa   :  { %v899_v58 = vpop.f32.mrf.mxu0  ;;  %v323_v23 = vpop.f32.mrf.mxu1  ;;  %v457_v24 = vmul.f32 %v724_v18, %v895_v48  ;;  %v389_v27 = vsel %vm388_vm0, %v893_v45, %v387_v19  ;;  %737 = vrsqrt.f32 %v921_v20  ;;  %v419_v59 = vand.u32 2147483648, %v918_v17 }
  0xfb   :  { %v936_v32 = vadd.f32 %v346_v22, %v337_v26  ;;  %v940_v35 = vsel %vm390_vm2, %v391_v31, %v389_v27  ;;  %739 = vrsqrt.f32 %v928_v25  ;;  %v726_v37 = vpop.eup %725  ;;  %v949_v39 = vadd.f32 %v374_v29, %v365_v28 }
  0xfc   :  { %v903_v62 = vpop.f32.mrf.mxu0  ;;  %v325_v33 = vpop.f32.mrf.mxu1  ;;  %v459_v36 = vsel %vm458_vm1, %v895_v48, %v457_v24  ;;  %v530_v44 = vadd.f32 1e-07, %v940_v35  ;;  %v394_v49 = vmul.f32 %v726_v37, %v901_v60  ;;  %v366_v54 = vmul.f32 %v323_v23, %v323_v23 }
  0xfd   :  { %741 = vrsqrt.f32 %v936_v32  ;;  %v728_v43 = vpop.eup %727  ;;  %v957_v45 = vsel %vm460_vm3, %v461_v34, %v459_v36  ;;  %v347_v52 = vmul.f32 %v903_v62, %v903_v62  ;;  %v375_v55 = vmul.f32 %v325_v33, %v325_v33 }
  0xfe   :  { %v910_v9 = vpop.f32.mrf.mxu0  ;;  %v327_v42 = vpop.f32.mrf.mxu1  ;;  %743 = vrsqrt.f32 %v949_v39  ;;  %v558_v57 = vadd.f32 1e-07, %v957_v45  ;;  %v338_v61 = vmul.f32 %v899_v58, %v899_v58  ;;  %v464_v2 = vmul.f32 %v728_v43, %v905_v63 }
  0xff   :  { %v730_v47 = vpop.eup %729  ;;  %745 = vlog2.f32 %v530_v44  ;;  %vm416_vm13 = vcmp.eq.f32.partialorder %v918_v17, inf  ;;  %vm486_vm14 = vcmp.eq.f32.partialorder %v921_v20, inf  ;;  %v396_v6 = vsel %vm395_vm4, %v901_v60, %v394_v49 }
 0x100   :  { %v279_v21 = vpop.f32.mrf.mxu0  ;;  %v329_v0 = vpop.f32.mrf.mxu1  ;;  %v401_v4 = vmul.f32 %v730_v47, %v907_v3  ;;  %v489_v7 = vand.u32 2147483648, %v921_v20  ;;  %v984_v58 = vadd.f32 %v347_v52, %v338_v61  ;;  %v339_v8 = vmul.f32 %v910_v9, %v910_v9 }
 0x101   :  { %v348_v62 = vmul.f32 %v279_v21, %v279_v21  ;;  %v732_v1 = vpop.eup %731  ;;  %vm479_vm0 = vcmp.eq.f32.partialorder %v928_v25, inf  ;;  %v990_v12 = vadd.f32 %v375_v55, %v366_v54  ;;  %v367_v13 = vmul.f32 %v327_v42, %v327_v42 }
 0x102   :  { %v933_v30 = vpop.f32.mrf.mxu0  ;;  %v734_v5 = vpop.eup %733  ;;  %v376_v15 = vmul.f32 %v329_v0, %v329_v0  ;;  %747 = vlog2.f32 %v558_v57  ;;  %v471_v21 = vmul.f32 %v732_v1, %v913_v11  ;;  %vm418_vm1 = vcmp.eq.f32.partialorder %v918_v17, 0.0 }
 0x103   :  { %v994_v22 = vadd.f32 %v348_v62, %v339_v8  ;;  %v340_v9 = vmul.f32 %v933_v30, %v933_v30  ;;  %v399_v23 = vsel %vm397_vm5, %v398_v38, %v396_v6  ;;  %v403_v24 = vsel %vm402_vm7, %v907_v3, %v401_v4 }
 0x104   :  { %v285_v40 = vpop.f32.mrf.mxu0  ;;  %v466_v26 = vsel %vm465_vm6, %v905_v63, %v464_v2  ;;  %v408_v27 = vmul.f32 %v734_v5, %v916_v14  ;;  %vm481_vm2 = vcmp.eq.f32.partialorder %v928_v25, 0.0  ;;  %749 = vrsqrt.f32 %v984_v58 }
 0x105   :  { %v349_v16 = vmul.f32 %v285_v40, %v285_v40  ;;  %vm488_vm3 = vcmp.eq.f32.partialorder %v921_v20, 0.0  ;;  %751 = vrsqrt.f32 %v990_v12  ;;  %v1015_v33 = vadd.f32 %v376_v15, %v367_v13 }
 0x106   :  { %v287_v56 = vpop.f32.mrf.mxu0  ;;  %v736_v10 = vpop.eup %735  ;;  %v469_v34 = vsel %vm467_vm8, %v468_v41, %v466_v26  ;;  %v473_v36 = vsel %vm472_vm9, %v913_v11, %v471_v21  ;;  %753 = vrsqrt.f32 %v994_v22  ;;  %v513_v40 = vsub.f32 %v957_v45, %v399_v23 }
 0x107   :  { %v738_v19 = vpop.eup %737  ;;  %v415_v28 = vmul.f32 %v736_v10, %v918_v17  ;;  %v1010_v29 = vadd.f32 %v349_v16, %v340_v9  ;;  %v359_v37 = vmul.f32 %v287_v56, %v287_v56  ;;  %v531_v42 = vadd.f32 1e-07, %v399_v23 }
 0x108   :  { %v289_v18 = vpop.f32.mrf.mxu0  ;;  %v740_v30 = vpop.eup %739  ;;  %v485_v31 = vmul.f32 %v738_v19, %v921_v20  ;;  %v406_v43 = vsel %vm404_vm10, %v405_v46, %v403_v24  ;;  %v410_v41 = vsel %vm409_vm11, %v916_v14, %v408_v27  ;;  %v559_v45 = vadd.f32 1e-07, %v469_v34 }
 0x109   :  { %v368_v60 = vmul.f32 %v289_v18, %v289_v18  ;;  %v478_v44 = vmul.f32 %v740_v30, %v928_v25  ;;  %v417_v47 = vsel %vm416_vm13, %v918_v17, %v415_v28  ;;  %755 = vrsqrt.f32 %v1010_v29 }
 0x10a   :  { %v742_v38 = vpop.eup %741  ;;  %v476_v3 = vsel %vm474_vm12, %v475_v50, %v473_v36  ;;  %v487_v46 = vsel %vm486_vm14, %v921_v20, %v485_v31  ;;  %757 = vrsqrt.f32 %v1015_v33  ;;  %v413_v54 = vsel %vm411_vm15, %v412_v51, %v410_v41 }
 0x10b   :  { %v1038_v49 = vadd.f32 %v368_v60, %v359_v37  ;;  %v744_v52 = vpop.eup %743  ;;  %v422_v55 = vmul.f32 %v742_v38, %v936_v32  ;;  %vm423_vm4 = vcmp.eq.f32.partialorder %v936_v32, inf  ;;  %v532_v50 = vadd.f32 1e-07, %v406_v43 }
 0x10c   :  { %v1059_v56 = vsel %vm418_vm1, %v419_v59, %v417_v47  ;;  %vm425_vm5 = vcmp.eq.f32.partialorder %v936_v32, 0.0  ;;  %v1062_v57 = vpop.eup %745  ;;  %v560_v14 = vadd.f32 1e-07, %v476_v3  ;;  %v480_v51 = vsel %vm479_vm0, %v928_v25, %v478_v44 }
 0x10d   :  { %759 = vrsqrt.f32 %v1038_v49  ;;  %v1069_v61 = vsel %vm488_vm3, %v489_v7, %v487_v46  ;;  %v614_v62 = vadd.f32 %v895_v48, %v1038_v49  ;;  %v1073_v0 = vmul.f32 %v513_v40, %v513_v40 }
 0x10e   :  { %761 = vlog2.f32 %v531_v42  ;;  %v533_v17 = vadd.f32 1e-07, %v413_v54  ;;  %v492_v59 = vmul.f32 %v744_v52, %v949_v39  ;;  %v534_v1 = vadd.f32 1e-07, %v1059_v56 }
 0x10f   :  { %763 = vlog2.f32 %v559_v45  ;;  %v424_v2 = vsel %vm423_vm4, %v936_v32, %v422_v55  ;;  %vm493_vm6 = vcmp.eq.f32.partialorder %v949_v39, inf  ;;  %v615_v4 = vadd.f32 %v614_v62, %v905_v63  ;;  %v1082_v5 = vpop.eup %747 }
 0x110   :  { %765 = vlog2.f32 %v532_v50  ;;  %v1088_v48 = vsel %vm481_vm2, %v482_v53, %v480_v51  ;;  %v426_v6 = vand.u32 2147483648, %v936_v32  ;;  %v562_v7 = vadd.f32 1e-07, %v1069_v61 }
 0x111   :  { %v1092_v8 = vsub.f32 %v469_v34, %v406_v43  ;;  %767 = vlog2.f32 %v560_v14  ;;  %v496_v10 = vand.u32 2147483648, %v949_v39  ;;  %v616_v63 = vadd.f32 %v615_v4, %v913_v11  ;;  %v750_v13 = vpop.eup %749 }
 0x112   :  { %769 = vlog2.f32 %v533_v17  ;;  %v1098_v15 = vsel %vm425_vm5, %v426_v6, %v424_v2  ;;  %v494_v53 = vsel %vm493_vm6, %v949_v39, %v492_v59  ;;  %vm495_vm7 = vcmp.eq.f32.partialorder %v949_v39, 0.0  ;;  %v752_v16 = vpop.eup %751 }
 0x113   :  { %v1102_v18 = vsub.f32 %v476_v3, %v413_v54  ;;  %771 = vlog2.f32 %v534_v1  ;;  %v1105_v19 = vadd.f32 1e-07, %v1088_v48  ;;  %v617_v21 = vadd.f32 %v616_v63, %v928_v25  ;;  %v754_v11 = vpop.eup %753 }
 0x114   :  { %773 = vlog2.f32 %v562_v7  ;;  %vm430_vm8 = vcmp.eq.f32.partialorder %v984_v58, inf  ;;  %vm432_vm9 = vcmp.eq.f32.partialorder %v984_v58, 0.0  ;;  %v433_v32 = vand.u32 2147483648, %v984_v58 }
 0x115   :  { %v535_v9 = vadd.f32 1e-07, %v1098_v15  ;;  %v429_v23 = vmul.f32 %v750_v13, %v984_v58  ;;  %v1113_v24 = vsel %vm495_vm7, %v496_v10, %v494_v53  ;;  %v618_v26 = vadd.f32 %v617_v21, %v921_v20 }
 0x116   :  { %v756_v27 = vpop.eup %755  ;;  %v499_v28 = vmul.f32 %v752_v16, %v990_v12  ;;  %vm500_vm10 = vcmp.eq.f32.partialorder %v990_v12, inf  ;;  %v503_v25 = vand.u32 2147483648, %v990_v12  ;;  %vm502_vm11 = vcmp.eq.f32.partialorder %v990_v12, 0.0 }
 0x117   :  { %v758_v60 = vpop.eup %757  ;;  %v436_v30 = vmul.f32 %v754_v11, %v994_v22  ;;  %vm437_vm12 = vcmp.eq.f32.partialorder %v994_v22, inf  ;;  %vm439_vm13 = vcmp.eq.f32.partialorder %v994_v22, 0.0  ;;  %v440_v31 = vand.u32 2147483648, %v994_v22 }
 0x118   :  { %v563_v20 = vadd.f32 1e-07, %v1113_v24  ;;  %vm507_vm14 = vcmp.eq.f32.partialorder %v1015_v33, inf  ;;  %vm509_vm15 = vcmp.eq.f32.partialorder %v1015_v33, 0.0  ;;  %v619_v36 = vadd.f32 %v618_v26, %v949_v39 }
 0x119   :  { %v431_v38 = vsel %vm430_vm8, %v984_v58, %v429_v23  ;;  %v510_v40 = vand.u32 2147483648, %v1015_v33  ;;  %v443_v42 = vmul.f32 %v756_v27, %v1010_v29  ;;  %v501_v41 = vsel %vm500_vm10, %v990_v12, %v499_v28 }
 0x11a   :  { %v760_v34 = vpop.eup %759  ;;  %vm451_vm0 = vcmp.eq.f32.partialorder %v1038_v49, inf  ;;  %v454_v44 = vand.u32 2147483648, %v1038_v49  ;;  %v620_v39 = vadd.f32 %v619_v36, %v990_v12  ;;  %v438_v45 = vsel %vm437_vm12, %v994_v22, %v436_v30 }
 0x11b   :  { %v762_v37 = vpop.eup %761  ;;  %v450_v43 = vmul.f32 %v760_v34, %v1038_v49  ;;  %v506_v3 = vmul.f32 %v758_v60, %v1015_v33  ;;  %vm453_vm1 = vcmp.eq.f32.partialorder %v1038_v49, 0.0  ;;  %v434_v52 = vsel %vm432_vm9, %v433_v32, %v431_v38 }
 0x11c   :  { %v764_v47 = vpop.eup %763  ;;  %vm444_vm2 = vcmp.eq.f32.partialorder %v1010_v29, inf  ;;  %v621_v55 = vadd.f32 %v620_v39, %v1015_v33  ;;  %v504_v14 = vsel %vm502_vm11, %v503_v25, %v501_v41  ;;  %vm446_vm3 = vcmp.eq.f32.partialorder %v1010_v29, 0.0 }
 0x11d   :  { %v452_v46 = vsel %vm451_vm0, %v1038_v49, %v450_v43  ;;  %v766_v50 = vpop.eup %765  ;;  %v445_v51 = vsel %vm444_vm2, %v1010_v29, %v443_v42  ;;  %v441_v49 = vsel %vm439_vm13, %v440_v31, %v438_v45  ;;  %v447_v58 = vand.u32 2147483648, %v1010_v29 }
 0x11e   :  { %v455_v54 = vsel %vm453_vm1, %v454_v44, %v452_v46  ;;  %v768_v59 = vpop.eup %767  ;;  %v536_v2 = vadd.f32 1e-07, %v434_v52  ;;  %v508_v12 = vsel %vm507_vm14, %v1015_v33, %v506_v3  ;;  %v564_v7 = vadd.f32 1e-07, %v504_v14  ;;  %623 = vst [vmem:[%s1187_s2 + $0x8] sm:$0xff] %v621_v55 }
 0x11f   :  { %v512_v62 = vsub.f32 %v455_v54, %v940_v35  ;;  %v557_v17 = vadd.f32 1e-07, %v455_v54  ;;  %v770_v1 = vpop.eup %769  ;;  %v516_v35 = vsub.f32 %v1088_v48, %v1059_v56  ;;  %v448_v22 = vsel %vm446_vm3, %v447_v58, %v445_v51 }
 0x120   :  { %v772_v6 = vpop.eup %771  ;;  %v523_v10 = vmul.f32 %v1092_v8, %v1092_v8  ;;  %v537_v63 = vadd.f32 1e-07, %v441_v49  ;;  %v524_v53 = vmul.f32 %v1102_v18, %v1102_v18  ;;  %v511_v56 = vsel %vm509_vm15, %v510_v40, %v508_v12 }
 0x121   :  { %v521_v4 = vmul.f32 %v512_v62, %v512_v62  ;;  %775 = vlog2.f32 %v557_v17  ;;  %v774_v29 = vpop.eup %773  ;;  %v517_v48 = vsub.f32 %v1069_v61, %v1098_v15  ;;  %v538_v16 = vadd.f32 1e-07, %v448_v22 }
 0x122   :  { %777 = vlog2.f32 %v535_v9  ;;  %v525_v11 = vmul.f32 %v516_v35, %v516_v35  ;;  %v518_v8 = vsub.f32 %v1113_v24, %v434_v52  ;;  %v519_v9 = vsub.f32 %v504_v14, %v441_v49 }
 0x123   :  { %779 = vlog2.f32 %v1105_v19  ;;  %v603_v13 = vadd.f32 %v1073_v0, %v521_v4  ;;  %v565_v19 = vadd.f32 1e-07, %v511_v56  ;;  %v526_v32 = vmul.f32 %v517_v48, %v517_v48 }
 0x124   :  { %781 = vlog2.f32 %v563_v20  ;;  %v542_v23 = vmul.f32 0.6931472, %v762_v37  ;;  %v569_v33 = vmul.f32 0.6931472, %v1082_v5  ;;  %v527_v26 = vmul.f32 %v518_v8, %v518_v8 }
 0x125   :  { %783 = vlog2.f32 %v536_v2  ;;  %v604_v21 = vadd.f32 %v603_v13, %v523_v10  ;;  %v520_v27 = vsub.f32 %v511_v56, %v448_v22  ;;  %v540_v15 = vmul.f32 0.6931472, %v1062_v57 }
 0x126   :  { %785 = vlog2.f32 %v564_v7  ;;  %v544_v28 = vmul.f32 0.6931472, %v766_v50  ;;  %v528_v25 = vmul.f32 %v519_v9, %v519_v9  ;;  %v571_v30 = vmul.f32 0.6931472, %v764_v47 }
 0x127   :  { %787 = vlog2.f32 %v537_v63  ;;  %v605_v0 = vadd.f32 %v604_v21, %v524_v53  ;;  %v546_v31 = vmul.f32 0.6931472, %v770_v1  ;;  %v573_v34 = vmul.f32 0.6931472, %v768_v59 }
 0x128   :  { %789 = vlog2.f32 %v538_v16  ;;  %v585_v36 = vsub.f32 %v542_v23, %v569_v33  ;;  %v529_v38 = vmul.f32 %v520_v27, %v520_v27  ;;  %v586_v43 = vsub.f32 %v544_v28, %v571_v30 }
 0x129   :  { %v606_v18 = vadd.f32 %v605_v0, %v525_v11  ;;  %791 = vlog2.f32 %v565_v19  ;;  %v548_v41 = vmul.f32 0.6931472, %v772_v6  ;;  %v587_v57 = vsub.f32 %v546_v31, %v573_v34 }
 0x12a   :  { %v577_v46 = vmul.f32 0.6931472, %v774_v29  ;;  %v594_v54 = vand.u32 2147483647, %v585_v36  ;;  %v595_v14 = vand.u32 2147483647, %v586_v43 }
 0x12b   :  { %v607_v61 = vadd.f32 %v606_v18, %v526_v32  ;;  %v596_v49 = vand.u32 2147483647, %v587_v57 }
 0x12d   :  { %v608_v60 = vadd.f32 %v607_v61, %v527_v26 }
 0x12e   :  { %v776_v24 = vpop.eup %775 }
 0x12f   :  { %v778_v20 = vpop.eup %777  ;;  %v567_v40 = vmul.f32 0.6931472, %v776_v24  ;;  %v609_v37 = vadd.f32 %v608_v60, %v528_v25 }
 0x130   :  { %v780_v42 = vpop.eup %779  ;;  %v550_v3 = vmul.f32 0.6931472, %v778_v20 }
 0x131   :  { %v782_v5 = vpop.eup %781  ;;  %v584_v44 = vsub.f32 %v540_v15, %v567_v40  ;;  %v610_v39 = vadd.f32 %v609_v37, %v529_v38  ;;  %v575_v47 = vmul.f32 0.6931472, %v780_v42 }
 0x132   :  { %v784_v45 = vpop.eup %783  ;;  %v589_v58 = vsub.f32 %v550_v3, %v577_v46  ;;  %v579_v1 = vmul.f32 0.6931472, %v782_v5 }
 0x133   :  { %v786_v52 = vpop.eup %785  ;;  %v593_v55 = vand.u32 2147483647, %v584_v44  ;;  %v588_v51 = vsub.f32 %v548_v41, %v575_v47  ;;  %v552_v62 = vmul.f32 0.6931472, %v784_v45  ;;  %612 = vst [vmem:[%s1187_s2] sm:$0xff] %v610_v39 }
 0x134   :  { %v788_v50 = vpop.eup %787  ;;  %v581_v12 = vmul.f32 0.6931472, %v786_v52  ;;  %v598_v10 = vand.u32 2147483647, %v589_v58 }
 0x135   :  { %v625_v17 = vadd.f32 %v594_v54, %v593_v55  ;;  %v790_v59 = vpop.eup %789  ;;  %v554_v2 = vmul.f32 0.6931472, %v788_v50  ;;  %v597_v35 = vand.u32 2147483647, %v588_v51  ;;  %v590_v7 = vsub.f32 %v552_v62, %v579_v1 }
 0x136   :  { %v792_v6 = vpop.eup %791  ;;  %v556_v22 = vmul.f32 0.6931472, %v790_v59 }
 0x137   :  { %v626_v4 = vadd.f32 %v625_v17, %v595_v14  ;;  %v591_v63 = vsub.f32 %v554_v2, %v581_v12  ;;  %v583_v13 = vmul.f32 0.6931472, %v792_v6  ;;  %v599_v56 = vand.u32 2147483647, %v590_v7 }
 0x139   :  { %v627_v29 = vadd.f32 %v626_v4, %v596_v49  ;;  %v592_v48 = vsub.f32 %v556_v22, %v583_v13  ;;  %v600_v21 = vand.u32 2147483647, %v591_v63 }
 0x13b   :  { %v628_v53 = vadd.f32 %v627_v29, %v597_v35  ;;  %v601_v8 = vand.u32 2147483647, %v592_v48 }
 0x13d   :  { %v629_v16 = vadd.f32 %v628_v53, %v598_v10 }
 0x13f   :  { %v630_v11 = vadd.f32 %v629_v16, %v599_v56 }
 0x141   :  { %v631_v19 = vadd.f32 %v630_v11, %v600_v21 }
 0x143   :  { %v632_v0 = vadd.f32 %v631_v19, %v601_v8 }
 0x145   :  { %634 = vst [vmem:[%s1187_s2 + $0x10] sm:$0xff] %v632_v0 }

</bundles_post_ra>
